<compile_context>
chip_gen: v7x
topology: tpu7x:2x2x1
jax: 0.10.0
libtpu: 0.0.40
codegen_flags: <defaults>
</compile_context>

<pallas_src>
import jax
import jax.numpy as jnp
from jax.experimental import pallas as pl
from jax.experimental.pallas import tpu as pltpu


# ----------------------------------------------------------------------------- kernels

def _make_node_kernel():
    """Per-molecule node-level work (grid=(B,)): O(N) matmuls + coordinate update."""

    def kernel(coords_ref, inv_ref, equi_ref,
               weq_ref, winv_ref, binv_ref, w1s_ref, w1e_ref, bfold_ref,
               wnode_ref, bnode_ref,
               co_ref, no_ref, sp_ref, ep_ref):
        # inv_proj = Linear(d_model, d_model) + SiLU   (bf16 MXU operands, f32 accumulate)
        nf = jax.nn.silu(
            jnp.dot(inv_ref[0].astype(jnp.bfloat16), winv_ref[...],
                    preferred_element_type=jnp.float32) + binv_ref[...])        # [N, D]
        nf_b = nf.astype(jnp.bfloat16)

        # bond_proj first Linear split by pair segment: per-node partial contributions
        sp_ref[0] = jnp.dot(nf_b, w1s_ref[...], preferred_element_type=jnp.float32)
        # fused bias (b1 + b_ep @ W1_edge) folded into the end-node partial ONCE here
        ep_ref[0] = (jnp.dot(nf_b, w1e_ref[...], preferred_element_type=jnp.float32)
                     + bfold_ref[...])

        # atom_proj | charge_proj fused into one lane-dense matmul
        no_ref[0] = (jnp.dot(nf_b, wnode_ref[...], preferred_element_type=jnp.float32)
                     + bnode_ref[...])

        # equi_proj (Linear(E, 1, bias=False)) and coordinate update, per xyz component
        cols = []
        for k in range(3):
            eqk = jnp.sum(equi_ref[0, k] * weq_ref[...], axis=1, keepdims=True)  # [N, 1]
            cols.append(coords_ref[0][:, k:k + 1] + eqk)
        co_ref[0] = jnp.concatenate(cols, axis=1)                                # [N, 3]

    return kernel


def _make_pair_kernel(n_atoms, tile_i):
    """Pairwise bond-logit work (grid=(B, N_pad // TI), both axes 'parallel')."""
    N, TI = n_atoms, tile_i

    def kernel(edge_ref, dist_ref, sp_ref, ep_ref,
               wec_ref, w1d_ref, w2_ref, b2_ref, bo_ref):
        # edge path: (edge*adj + transpose) @ (W_edge_proj @ W1_edge) -- one bf16 MXU matmul
        ec = jnp.dot(edge_ref[0], wec_ref[...],
                     preferred_element_type=jnp.float32)                         # [TI*N, De]
        # distance contribution (distances precomputed lane-dense in the wrapper)
        ec = ec + dist_ref[0].astype(jnp.float32) * w1d_ref[...]
        de = ec.shape[-1]

        # vectorized 3-D broadcasts: row i gets node-i partial, column j gets node-j partial
        pre = (ec.reshape(TI, N, de)
               + sp_ref[0][:, None, :]          # start-node (i) partial (sublane broadcast)
               + ep_ref[0][None, :, :])         # end-node  (j) partial (+ folded biases)

        # silu kept in f32 for portability (v5e has no bf16 VPU/EUP); cast once for the MXU
        h = jax.nn.silu(pre).astype(jnp.bfloat16).reshape(TI * N, de)
        bo_ref[0] = (jnp.dot(h, w2_ref[...], preferred_element_type=jnp.float32)
                     + b2_ref[...]).astype(bo_ref.dtype)                         # bf16 writeback

    return kernel


# ----------------------------------------------------------------------------- helpers

def _tpu_vmem_capacity():
    try:
        return int(pltpu.get_tpu_info().vmem_capacity_bytes)
    except Exception:
        return 128 * 2 ** 20


def _vmem_limit_bytes():
    cap = _tpu_vmem_capacity()
    return int(min(100 * 2 ** 20, (cap * 3) // 4))     # ~96 MiB on v5e/v6e, ~48 MiB on v7x


def _choose_tiling(n8, d_edge, n_types):
    """Generation-aware i-tile size.  Returns (tile_i, n_pad) with n_pad % tile_i == 0."""
    cap = _tpu_vmem_capacity()
    budget = max(cap // 3, 8 * 2 ** 20)          # pair-path working-set budget (v7x ~21 MiB)

    def lane(c):                                 # narrow last dims are lane-padded in VMEM
        return ((c + 127) // 128) * 128

    # bytes of live VMEM per i-row of a tile: double-buffered I/O + f32 intermediates
    per_row = n8 * (2 * 2 * lane(d_edge)         # edge in  (bf16, 2 buffers)
                    + 2 * 2 * lane(1)            # dist in  (bf16, 2 buffers)
                    + 2 * 2 * lane(n_types)      # bond out (bf16, 2 buffers)
                    + 3 * 4 * lane(d_edge))      # ec / pre / h f32 intermediates
    max_ti = max(8, min(256, (budget // per_row) // 8 * 8))
    if n8 <= max_ti:
        return n8, n8                            # single i-tile, no extra padding

    # pick TI minimizing padded pair work + per-grid-step overhead (~0.35 us / step)
    per_pair_t = (2 * d_edge + 2 * n_types + 2) / 1.0e12
    step_t = 0.35e-6
    best = None
    for ti in range(8, max_ti + 1, 8):
        n_pad = -(-n8 // ti) * ti
        t = n_pad * n_pad * per_pair_t + (n_pad // ti) * step_t
        key = (t, -ti)
        if best is None or key < best[0]:
            best = (key, ti, n_pad)
    return best[1], best[2]


def _prepare_kernel_weights(p):
    """Split / fuse the module weights into kernel operands (weights stored [in, out])."""
    bf16, f32 = jnp.bfloat16, jnp.float32
    D = p["W_inv"].shape[0]
    De = p["W_ep"].shape[0]
    W1 = p["W1"].astype(f32)
    W1_start = W1[:D, :]
    W1_end = W1[D:2 * D, :]
    W1_edge = W1[2 * D:2 * D + De, :]
    w1_dist = W1[2 * D + De:2 * D + De + 1, :]                              # [1, De]
    W_ec = p["W_ep"].astype(f32) @ W1_edge                                  # edge_feat_proj folded in
    b_fold = p["b1"].reshape(1, De) + p["b_ep"].reshape(1, De) @ W1_edge    # fused biases
    W_node = jnp.concatenate([p["W_atom"], p["W_charge"]], axis=1)          # atom | charge fused
    b_node = jnp.concatenate([p["b_atom"].reshape(1, -1),
                              p["b_charge"].reshape(1, -1)], axis=1)
    node_w = [
        p["w_eq"].reshape(1, -1).astype(f32),    # (1, E)
        p["W_inv"].astype(bf16),                 # (D, D)
        p["b_inv"].reshape(1, -1).astype(f32),   # (1, D)
        W1_start.astype(bf16),                   # (D, De)
        W1_end.astype(bf16),                     # (D, De)
        b_fold.astype(f32),                      # (1, De)  (folded into end-node partial)
        W_node.astype(bf16),                     # (D, V + C)
        b_node.astype(f32),                      # (1, V + C)
    ]
    pair_w = [
        W_ec.astype(bf16),                       # (De, De)
        w1_dist.astype(f32),                     # (1, De)
        p["W2"].astype(bf16),                    # (De, T)
        p["b2"].reshape(1, -1).astype(f32),      # (1, T)
    ]
    return node_w, pair_w


# ----------------------------------------------------------------------------- wrapper

def eqgat_prediction_head(coords, inv_feats, equi_feats, adj_matrix, atom_mask, edge_feats, params):
    """Pallas TPU forward pass of EqgatPredictionHead.

    Returns (coords_out, atom_logits, bond_logits, charge_logits).
    atom_mask is accepted for API parity but (like the reference forward) unused.
    """
    del atom_mask
    f32, bf16 = jnp.float32, jnp.bfloat16
    coords = coords.astype(f32)
    inv_feats = inv_feats.astype(f32)
    equi_feats = equi_feats.astype(f32)
    adj = adj_matrix
    edge = edge_feats

    B, N, _ = coords.shape
    D = inv_feats.shape[-1]
    E = equi_feats.shape[2]
    De = edge.shape[-1]
    V = params["W_atom"].shape[1]
    Cq = params["W_charge"].shape[1]
    T = params["W2"].shape[1]
    VC = V + Cq

    # ---- tiling: pad atom count so the i-tile divides it exactly (no degenerate TI=8 tiling).
    # Padding is inert: padded rows/cols of every output depend only on padded inputs and are
    # sliced off below.
    N8 = ((N + 7) // 8) * 8
    TI, N_pad = _choose_tiling(N8, De, T)
    pad = N_pad - N
    if pad:
        coords = jnp.pad(coords, ((0, 0), (0, pad), (0, 0)))
        inv_feats = jnp.pad(inv_feats, ((0, 0), (0, pad), (0, 0)))
        equi_feats = jnp.pad(equi_feats, ((0, 0), (0, pad), (0, 0), (0, 0)))
        adj = jnp.pad(adj, ((0, 0), (0, pad), (0, pad)))
        edge = jnp.pad(edge, ((0, 0), (0, pad), (0, pad), (0, 0)))

    # wrapper-side layout plumbing (fused by XLA):
    #   equi -> component-major [B, 3, N, E] (lane dim = E)
    #   edge -> bf16 FIRST, then adjacency-mask + symmetrise (halves pre-pass HBM traffic),
    #           flattened pair-major [B, N*N, De]
    equi_cm = jnp.transpose(equi_feats, (0, 3, 1, 2))
    em = edge.astype(bf16) * adj.astype(bf16)[..., None]
    edge_sym = (em + jnp.swapaxes(em, 1, 2)).reshape(B, N_pad * N_pad, De)

    node_w, pair_w = _prepare_kernel_weights(params)
    vmem_limit = _vmem_limit_bytes()

    # ---------------------------------------------------------------- node-level kernel (grid=(B,))
    def _rep1(shape):
        nd = len(shape)
        return pl.BlockSpec(tuple(shape), lambda b, _nd=nd: (0,) * _nd)

    node_in_specs = [
        pl.BlockSpec((1, N_pad, 3), lambda b: (b, 0, 0)),           # coords
        pl.BlockSpec((1, N_pad, D), lambda b: (b, 0, 0)),           # invariant feats
        pl.BlockSpec((1, 3, N_pad, E), lambda b: (b, 0, 0, 0)),     # equivariant feats (component-major)
    ] + [_rep1(w.shape) for w in node_w]

    node_out_shape = (
        jax.ShapeDtypeStruct((B, N_pad, 3), f32),                   # coords_out
        jax.ShapeDtypeStruct((B, N_pad, VC), f32),                  # atom | charge logits slab
        jax.ShapeDtypeStruct((B, N_pad, De), f32),                  # start-node partials
        jax.ShapeDtypeStruct((B, N_pad, De), f32),                  # end-node partials (+ fused biases)
    )
    node_out_specs = (
        pl.BlockSpec((1, N_pad, 3), lambda b: (b, 0, 0)),
        pl.BlockSpec((1, N_pad, VC), lambda b: (b, 0, 0)),
        pl.BlockSpec((1, N_pad, De), lambda b: (b, 0, 0)),
        pl.BlockSpec((1, N_pad, De), lambda b: (b, 0, 0)),
    )

    coords_out_p, node_logits_p, s_part, e_part = pl.pallas_call(
        _make_node_kernel(),
        out_shape=node_out_shape,
        grid=(B,),
        in_specs=node_in_specs,
        out_specs=node_out_specs,
        compiler_params=pltpu.CompilerParams(
            dimension_semantics=("parallel",),
            vmem_limit_bytes=vmem_limit,
        ),
    )(coords, inv_feats, equi_cm, *node_w)

    # ---------------------------------------------------------------- distances (lane-dense pre-pass)
    # Pair-major bf16 distances -> the kernel's distance term is a plain lane broadcast,
    # no per-row VPU/EUP math and no sqrt inside the hot kernel.
    diff = coords_out_p[:, :, None, :] - coords_out_p[:, None, :, :]
    dist = jnp.sqrt(jnp.sum(diff * diff, axis=-1)).reshape(B, N_pad * N_pad, 1).astype(bf16)

    # ---------------------------------------------------------------- pair-level kernel (grid=(B, NI))
    NI = N_pad // TI
    PT = TI * N_pad

    def _rep2(shape):
        nd = len(shape)
        return pl.BlockSpec(tuple(shape), lambda b, t, _nd=nd: (0,) * _nd)

    pair_in_specs = [
        pl.BlockSpec((1, PT, De), lambda b, t: (b, t, 0)),          # symmetrised edge feats (pair tile)
        pl.BlockSpec((1, PT, 1), lambda b, t: (b, t, 0)),           # distances (pair tile)
        pl.BlockSpec((1, TI, De), lambda b, t: (b, t, 0)),          # start-node partials (i tile)
        pl.BlockSpec((1, N_pad, De), lambda b, t: (b, 0, 0)),       # end-node partials (all j)
    ] + [_rep2(w.shape) for w in pair_w]

    bond_flat = pl.pallas_call(
        _make_pair_kernel(N_pad, TI),
        out_shape=jax.ShapeDtypeStruct((B, N_pad * N_pad, T), bf16),   # bf16 writeback of N^2 output
        grid=(B, NI),
        in_specs=pair_in_specs,
        out_specs=pl.BlockSpec((1, PT, T), lambda b, t: (b, t, 0)),
        compiler_params=pltpu.CompilerParams(
            dimension_semantics=("parallel", "parallel"),            # both axes megacore-shardable
            vmem_limit_bytes=vmem_limit,
        ),
    )(edge_sym, dist, s_part, e_part, *pair_w)

    coords_out = coords_out_p[:, :N, :]
    atom_logits = node_logits_p[:, :N, :V]
    charge_logits = node_logits_p[:, :N, V:]
    # production consumers could keep bond logits in bf16; cast back to f32 for API parity
    bond_logits = bond_flat.reshape(B, N_pad, N_pad, T)[:, :N, :N, :].astype(f32)
    return coords_out, atom_logits, bond_logits, charge_logits


# ----------------------------------------------------------------------------- params / reference

def init_params(key, d_model, n_equi_feats, d_edge, vocab_size, n_edge_types, n_charges):
    """Deterministic synthetic parameters, stored [in, out]."""
    D, E, De = d_model, n_equi_feats, d_edge
    ks = jax.random.split(key, 16)

    def lin(k, fin, fout):
        return jax.random.normal(k, (fin, fout), jnp.float32) / jnp.sqrt(fin)

    def bias(k, fout):
        return 0.02 * jax.random.normal(k, (fout,), jnp.float32)

    edge_in = 2 * D + De + 1
    return {
        "W_inv": lin(ks[0], D, D), "b_inv": bias(ks[1], D),
        "W_ep": lin(ks[2], De, De), "b_ep": bias(ks[3], De),
        "w_eq": lin(ks[4], E, 1).reshape(E),
        "W_atom": lin(ks[5], D, vocab_size), "b_atom": bias(ks[6], vocab_size),
        "W_charge": lin(ks[7], D, n_charges), "b_charge": bias(ks[8], n_charges),
        "W1": lin(ks[9], edge_in, De), "b1": bias(ks[10], De),
        "W2": lin(ks[11], De, n_edge_types), "b2": bias(ks[12], n_edge_types),
    }


def reference_forward(coords, inv_feats, equi_feats, adj, edge_feats, p):
    """Pure-JAX f32 reference matching EqgatPredictionHead.forward."""
    eqp = jnp.einsum("bnek,e->bnk", equi_feats, p["w_eq"])
    coords_out = coords + eqp
    em = edge_feats * adj[..., None]
    edge_in = em + jnp.swapaxes(em, 1, 2)
    edge_proj = edge_in @ p["W_ep"] + p["b_ep"]
    nf = jax.nn.silu(inv_feats @ p["W_inv"] + p["b_inv"])
    B, N, D = nf.shape
    start = jnp.broadcast_to(nf[:, :, None, :], (B, N, N, D))
    end = jnp.broadcast_to(nf[:, None, :, :], (B, N, N, D))
    diff = coords_out[:, :, None, :] - coords_out[:, None, :, :]
    dist = jnp.sqrt(jnp.sum(diff * diff, axis=-1, keepdims=True))
    pair = jnp.concatenate([start, end, edge_proj, dist], axis=-1)
    h = jax.nn.silu(pair @ p["W1"] + p["b1"])
    bond = h @ p["W2"] + p["b2"]
    atom = nf @ p["W_atom"] + p["b_atom"]
    charge = nf @ p["W_charge"] + p["b_charge"]
    return coords_out, atom, bond, charge


# ----------------------------------------------------------------------------- demo

if __name__ == "__main__":
    B, N = 2, 16
    d_model, n_equi, d_edge = 32, 16, 16
    vocab, n_edge_types, n_charges = 8, 5, 7

    key = jax.random.PRNGKey(0)
    kc, ki, ke, ka, kf, kp = jax.random.split(key, 6)
    coords = jax.random.normal(kc, (B, N, 3), jnp.float32)
    inv_feats = jax.random.normal(ki, (B, N, d_model), jnp.float32)
    equi_feats = jax.random.normal(ke, (B, N, n_equi, 3), jnp.float32)
    adj = (jax.random.uniform(ka, (B, N, N)) > 0.5).astype(jnp.float32)
    adj = jnp.maximum(adj, jnp.swapaxes(adj, 1, 2))
    atom_mask = jnp.ones((B, N), jnp.float32)
    edge_feats = jax.random.normal(kf, (B, N, N, d_edge), jnp.float32)

    params = init_params(kp, d_model, n_equi, d_edge, vocab, n_edge_types, n_charges)

    outs = eqgat_prediction_head(coords, inv_feats, equi_feats, adj, atom_mask, edge_feats, params)
    outs = jax.block_until_ready(outs)
    coords_out, atom_logits, bond_logits, charge_logits = outs

    assert coords_out.shape == (B, N, 3)
    assert atom_logits.shape == (B, N, vocab)
    assert bond_logits.shape == (B, N, N, n_edge_types)
    assert charge_logits.shape == (B, N, n_charges)
    assert all(bool(jnp.all(jnp.isfinite(o))) for o in outs)

    # correctness vs the pure-JAX f32 reference (bf16 MXU operands / bf16 edge, dist, bond
    # writeback -> loose tolerance)
    ref = reference_forward(coords, inv_feats, equi_feats, adj, edge_feats, params)
    for got, want in zip(outs, ref):
        err = float(jnp.max(jnp.abs(got - want)))
        tol = 5e-2 + 5e-2 * float(jnp.max(jnp.abs(want)))
        assert err < tol, (err, tol)

    print("KERNEL_OK")
</pallas_src>

<mosaic_0001>
module attributes {stable_mosaic.version = 11 : i64} {
  func.func @kernel(%arg0: i32, %arg1: memref<1x16x3xf32, #tpu.memory_space<vmem>>, %arg2: memref<1x16x32xf32, #tpu.memory_space<vmem>>, %arg3: memref<1x3x16x16xf32, #tpu.memory_space<vmem>>, %arg4: memref<1x16xf32, #tpu.memory_space<vmem>>, %arg5: memref<32x32xbf16, #tpu.memory_space<vmem>>, %arg6: memref<1x32xf32, #tpu.memory_space<vmem>>, %arg7: memref<32x16xbf16, #tpu.memory_space<vmem>>, %arg8: memref<32x16xbf16, #tpu.memory_space<vmem>>, %arg9: memref<1x16xf32, #tpu.memory_space<vmem>>, %arg10: memref<32x15xbf16, #tpu.memory_space<vmem>>, %arg11: memref<1x15xf32, #tpu.memory_space<vmem>>, %arg12: memref<1x16x3xf32, #tpu.memory_space<vmem>>, %arg13: memref<1x16x15xf32, #tpu.memory_space<vmem>>, %arg14: memref<1x16x16xf32, #tpu.memory_space<vmem>>, %arg15: memref<1x16x16xf32, #tpu.memory_space<vmem>>) attributes {dimension_semantics = [#tpu.dimension_semantics<parallel>], iteration_bounds = array<i64: 2>, scalar_prefetch = 0 : i64, scratch_operands = 0 : i64, tpu.core_type = #tpu.core_type<tc>, window_params = [{transform_indices = @transform_0, window_bounds = array<i64: 1, 16, 3>}, {transform_indices = @transform_1, window_bounds = array<i64: 1, 16, 32>}, {transform_indices = @transform_2, window_bounds = array<i64: 1, 3, 16, 16>}, {pipeline_mode = #tpu.pipeline_mode<synchronous>, transform_indices = @transform_3, window_bounds = array<i64: 1, 16>}, {pipeline_mode = #tpu.pipeline_mode<synchronous>, transform_indices = @transform_4, window_bounds = array<i64: 32, 32>}, {pipeline_mode = #tpu.pipeline_mode<synchronous>, transform_indices = @transform_5, window_bounds = array<i64: 1, 32>}, {pipeline_mode = #tpu.pipeline_mode<synchronous>, transform_indices = @transform_6, window_bounds = array<i64: 32, 16>}, {pipeline_mode = #tpu.pipeline_mode<synchronous>, transform_indices = @transform_7, window_bounds = array<i64: 32, 16>}, {pipeline_mode = #tpu.pipeline_mode<synchronous>, transform_indices = @transform_8, window_bounds = array<i64: 1, 16>}, {pipeline_mode = #tpu.pipeline_mode<synchronous>, transform_indices = @transform_9, window_bounds = array<i64: 32, 15>}, {pipeline_mode = #tpu.pipeline_mode<synchronous>, transform_indices = @transform_10, window_bounds = array<i64: 1, 15>}, {transform_indices = @transform_11, window_bounds = array<i64: 1, 16, 3>}, {transform_indices = @transform_12, window_bounds = array<i64: 1, 16, 15>}, {transform_indices = @transform_13, window_bounds = array<i64: 1, 16, 16>}, {transform_indices = @transform_14, window_bounds = array<i64: 1, 16, 16>}]} {
    %c0 = arith.constant 0 : index
    %c0_0 = arith.constant 0 : index
    %c0_1 = arith.constant 0 : index
    %0 = vector.load %arg2[%c0, %c0_0, %c0_1] : memref<1x16x32xf32, #tpu.memory_space<vmem>>, vector<1x16x32xf32>
    %1 = vector.shape_cast %0 : vector<1x16x32xf32> to vector<16x32xf32>
    %2 = arith.truncf %1 : vector<16x32xf32> to vector<16x32xbf16>
    %c0_2 = arith.constant 0 : index
    %c0_3 = arith.constant 0 : index
    %3 = vector.load %arg5[%c0_2, %c0_3] : memref<32x32xbf16, #tpu.memory_space<vmem>>, vector<32x32xbf16>
    %cst = arith.constant dense<0.000000e+00> : vector<16x32xf32>
    %4 = tpu.matmul %2, %3, %cst {dimension_numbers = #tpu.dot_dimension_numbers<[1], [0], [0], [1], [0, 0, 1, 1], [], []>} : vector<16x32xbf16>, vector<32x32xbf16>, vector<16x32xf32> -> vector<16x32xf32>
    %c0_4 = arith.constant 0 : index
    %c0_5 = arith.constant 0 : index
    %5 = vector.load %arg6[%c0_4, %c0_5] : memref<1x32xf32, #tpu.memory_space<vmem>>, vector<1x32xf32>
    %6 = vector.broadcast %5 : vector<1x32xf32> to vector<16x32xf32>
    %7 = arith.addf %4, %6 : vector<16x32xf32>
    %8 = arith.negf %7 : vector<16x32xf32>
    %9 = math.exp %8 : vector<16x32xf32>
    %cst_6 = arith.constant 1.000000e+00 : f32
    %10 = vector.broadcast %cst_6 : f32 to vector<16x32xf32>
    %11 = arith.addf %10, %9 : vector<16x32xf32>
    %12 = arith.divf %10, %11 : vector<16x32xf32>
    %13 = arith.mulf %7, %12 : vector<16x32xf32>
    %14 = arith.truncf %13 : vector<16x32xf32> to vector<16x32xbf16>
    %c0_7 = arith.constant 0 : index
    %c0_8 = arith.constant 0 : index
    %15 = vector.load %arg7[%c0_7, %c0_8] : memref<32x16xbf16, #tpu.memory_space<vmem>>, vector<32x16xbf16>
    %cst_9 = arith.constant dense<0.000000e+00> : vector<16x16xf32>
    %16 = tpu.matmul %14, %15, %cst_9 {dimension_numbers = #tpu.dot_dimension_numbers<[1], [0], [0], [1], [0, 0, 1, 1], [], []>} : vector<16x32xbf16>, vector<32x16xbf16>, vector<16x16xf32> -> vector<16x16xf32>
    %c0_10 = arith.constant 0 : index
    %c0_11 = arith.constant 0 : index
    %c0_12 = arith.constant 0 : index
    %17 = vector.load %arg14[%c0_10, %c0_11, %c0_12] : memref<1x16x16xf32, #tpu.memory_space<vmem>>, vector<1x16x16xf32>
    %18 = vector.shape_cast %17 : vector<1x16x16xf32> to vector<16x16xf32>
    %19 = vector.shape_cast %16 : vector<16x16xf32> to vector<1x16x16xf32>
    tpu.vector_store %arg14[%c0_10, %c0_11, %c0_12], %19 {strides = array<i32>} : memref<1x16x16xf32, #tpu.memory_space<vmem>>, vector<1x16x16xf32>,
    %c0_13 = arith.constant 0 : index
    %c0_14 = arith.constant 0 : index
    %20 = vector.load %arg8[%c0_13, %c0_14] : memref<32x16xbf16, #tpu.memory_space<vmem>>, vector<32x16xbf16>
    %cst_15 = arith.constant dense<0.000000e+00> : vector<16x16xf32>
    %21 = tpu.matmul %14, %20, %cst_15 {dimension_numbers = #tpu.dot_dimension_numbers<[1], [0], [0], [1], [0, 0, 1, 1], [], []>} : vector<16x32xbf16>, vector<32x16xbf16>, vector<16x16xf32> -> vector<16x16xf32>
    %c0_16 = arith.constant 0 : index
    %c0_17 = arith.constant 0 : index
    %22 = vector.load %arg9[%c0_16, %c0_17] : memref<1x16xf32, #tpu.memory_space<vmem>>, vector<1x16xf32>
    %23 = vector.broadcast %22 : vector<1x16xf32> to vector<16x16xf32>
    %24 = arith.addf %21, %23 : vector<16x16xf32>
    %c0_18 = arith.constant 0 : index
    %c0_19 = arith.constant 0 : index
    %c0_20 = arith.constant 0 : index
    %25 = vector.load %arg15[%c0_18, %c0_19, %c0_20] : memref<1x16x16xf32, #tpu.memory_space<vmem>>, vector<1x16x16xf32>
    %26 = vector.shape_cast %25 : vector<1x16x16xf32> to vector<16x16xf32>
    %27 = vector.shape_cast %24 : vector<16x16xf32> to vector<1x16x16xf32>
    tpu.vector_store %arg15[%c0_18, %c0_19, %c0_20], %27 {strides = array<i32>} : memref<1x16x16xf32, #tpu.memory_space<vmem>>, vector<1x16x16xf32>,
    %c0_21 = arith.constant 0 : index
    %c0_22 = arith.constant 0 : index
    %28 = vector.load %arg10[%c0_21, %c0_22] : memref<32x15xbf16, #tpu.memory_space<vmem>>, vector<32x15xbf16>
    %cst_23 = arith.constant dense<0.000000e+00> : vector<16x15xf32>
    %29 = tpu.matmul %14, %28, %cst_23 {dimension_numbers = #tpu.dot_dimension_numbers<[1], [0], [0], [1], [0, 0, 1, 1], [], []>} : vector<16x32xbf16>, vector<32x15xbf16>, vector<16x15xf32> -> vector<16x15xf32>
    %c0_24 = arith.constant 0 : index
    %c0_25 = arith.constant 0 : index
    %30 = vector.load %arg11[%c0_24, %c0_25] : memref<1x15xf32, #tpu.memory_space<vmem>>, vector<1x15xf32>
    %31 = vector.broadcast %30 : vector<1x15xf32> to vector<16x15xf32>
    %32 = arith.addf %29, %31 : vector<16x15xf32>
    %c0_26 = arith.constant 0 : index
    %c0_27 = arith.constant 0 : index
    %c0_28 = arith.constant 0 : index
    %33 = vector.load %arg13[%c0_26, %c0_27, %c0_28] : memref<1x16x15xf32, #tpu.memory_space<vmem>>, vector<1x16x15xf32>
    %34 = vector.shape_cast %33 : vector<1x16x15xf32> to vector<16x15xf32>
    %35 = vector.shape_cast %32 : vector<16x15xf32> to vector<1x16x15xf32>
    tpu.vector_store %arg13[%c0_26, %c0_27, %c0_28], %35 {strides = array<i32>} : memref<1x16x15xf32, #tpu.memory_space<vmem>>, vector<1x16x15xf32>,
    %c0_29 = arith.constant 0 : index
    %c0_30 = arith.constant 0 : index
    %c0_31 = arith.constant 0 : index
    %c0_32 = arith.constant 0 : index
    %36 = vector.load %arg3[%c0_29, %c0_30, %c0_31, %c0_32] : memref<1x3x16x16xf32, #tpu.memory_space<vmem>>, vector<1x1x16x16xf32>
    %37 = vector.shape_cast %36 : vector<1x1x16x16xf32> to vector<16x16xf32>
    %c0_33 = arith.constant 0 : index
    %c0_34 = arith.constant 0 : index
    %38 = vector.load %arg4[%c0_33, %c0_34] : memref<1x16xf32, #tpu.memory_space<vmem>>, vector<1x16xf32>
    %39 = vector.broadcast %38 : vector<1x16xf32> to vector<16x16xf32>
    %40 = arith.mulf %37, %39 : vector<16x16xf32>
    %cst_35 = arith.constant dense<0.000000e+00> : vector<16xf32>
    %41 = vector.multi_reduction <add>, %40, %cst_35 [1] : vector<16x16xf32> to vector<16xf32>
    %42 = vector.shape_cast %41 : vector<16xf32> to vector<16x1xf32>
    %c0_36 = arith.constant 0 : index
    %c0_37 = arith.constant 0 : index
    %c0_38 = arith.constant 0 : index
    %43 = vector.load %arg1[%c0_36, %c0_37, %c0_38] : memref<1x16x3xf32, #tpu.memory_space<vmem>>, vector<1x16x3xf32>
    %44 = vector.shape_cast %43 : vector<1x16x3xf32> to vector<16x3xf32>
    %45 = vector.extract_strided_slice %44 {offsets = [0, 0], sizes = [16, 1], strides = [1, 1]} : vector<16x3xf32> to vector<16x1xf32>
    %46 = arith.addf %45, %42 : vector<16x1xf32>
    %c0_39 = arith.constant 0 : index
    %c1 = arith.constant 1 : index
    %c0_40 = arith.constant 0 : index
    %c0_41 = arith.constant 0 : index
    %47 = vector.load %arg3[%c0_39, %c1, %c0_40, %c0_41] : memref<1x3x16x16xf32, #tpu.memory_space<vmem>>, vector<1x1x16x16xf32>
    %48 = vector.shape_cast %47 : vector<1x1x16x16xf32> to vector<16x16xf32>
    %c0_42 = arith.constant 0 : index
    %c0_43 = arith.constant 0 : index
    %49 = vector.load %arg4[%c0_42, %c0_43] : memref<1x16xf32, #tpu.memory_space<vmem>>, vector<1x16xf32>
    %50 = vector.broadcast %49 : vector<1x16xf32> to vector<16x16xf32>
    %51 = arith.mulf %48, %50 : vector<16x16xf32>
    %cst_44 = arith.constant dense<0.000000e+00> : vector<16xf32>
    %52 = vector.multi_reduction <add>, %51, %cst_44 [1] : vector<16x16xf32> to vector<16xf32>
    %53 = vector.shape_cast %52 : vector<16xf32> to vector<16x1xf32>
    %c0_45 = arith.constant 0 : index
    %c0_46 = arith.constant 0 : index
    %c0_47 = arith.constant 0 : index
    %54 = vector.load %arg1[%c0_45, %c0_46, %c0_47] : memref<1x16x3xf32, #tpu.memory_space<vmem>>, vector<1x16x3xf32>
    %55 = vector.shape_cast %54 : vector<1x16x3xf32> to vector<16x3xf32>
    %56 = vector.extract_strided_slice %55 {offsets = [0, 1], sizes = [16, 1], strides = [1, 1]} : vector<16x3xf32> to vector<16x1xf32>
    %57 = arith.addf %56, %53 : vector<16x1xf32>
    %c0_48 = arith.constant 0 : index
    %c2 = arith.constant 2 : index
    %c0_49 = arith.constant 0 : index
    %c0_50 = arith.constant 0 : index
    %58 = vector.load %arg3[%c0_48, %c2, %c0_49, %c0_50] : memref<1x3x16x16xf32, #tpu.memory_space<vmem>>, vector<1x1x16x16xf32>
    %59 = vector.shape_cast %58 : vector<1x1x16x16xf32> to vector<16x16xf32>
    %c0_51 = arith.constant 0 : index
    %c0_52 = arith.constant 0 : index
    %60 = vector.load %arg4[%c0_51, %c0_52] : memref<1x16xf32, #tpu.memory_space<vmem>>, vector<1x16xf32>
    %61 = vector.broadcast %60 : vector<1x16xf32> to vector<16x16xf32>
    %62 = arith.mulf %59, %61 : vector<16x16xf32>
    %cst_53 = arith.constant dense<0.000000e+00> : vector<16xf32>
    %63 = vector.multi_reduction <add>, %62, %cst_53 [1] : vector<16x16xf32> to vector<16xf32>
    %64 = vector.shape_cast %63 : vector<16xf32> to vector<16x1xf32>
    %c0_54 = arith.constant 0 : index
    %c0_55 = arith.constant 0 : index
    %c0_56 = arith.constant 0 : index
    %65 = vector.load %arg1[%c0_54, %c0_55, %c0_56] : memref<1x16x3xf32, #tpu.memory_space<vmem>>, vector<1x16x3xf32>
    %66 = vector.shape_cast %65 : vector<1x16x3xf32> to vector<16x3xf32>
    %67 = vector.extract_strided_slice %66 {offsets = [0, 2], sizes = [16, 1], strides = [1, 1]} : vector<16x3xf32> to vector<16x1xf32>
    %68 = arith.addf %67, %64 : vector<16x1xf32>
    %69 = tpu.concatenate %46, %57, %68 in 1 : vector<16x1xf32>, vector<16x1xf32>, vector<16x1xf32> -> vector<16x3xf32>
    %c0_57 = arith.constant 0 : index
    %c0_58 = arith.constant 0 : index
    %c0_59 = arith.constant 0 : index
    %70 = vector.load %arg12[%c0_57, %c0_58, %c0_59] : memref<1x16x3xf32, #tpu.memory_space<vmem>>, vector<1x16x3xf32>
    %71 = vector.shape_cast %70 : vector<1x16x3xf32> to vector<16x3xf32>
    %72 = vector.shape_cast %69 : vector<16x3xf32> to vector<1x16x3xf32>
    tpu.vector_store %arg12[%c0_57, %c0_58, %c0_59], %72 {strides = array<i32>} : memref<1x16x3xf32, #tpu.memory_space<vmem>>, vector<1x16x3xf32>,
    return
  }
  func.func @transform_0(%arg0: i32) -> (i32, i32, i32) {
    %c0_i32 = arith.constant 0 : i32
    %c0_i32_0 = arith.constant 0 : i32
    %c0_i32_1 = arith.constant 0 : i32
    return %arg0, %c0_i32, %c0_i32_0 : i32, i32, i32
  }
  func.func @transform_1(%arg0: i32) -> (i32, i32, i32) {
    %c0_i32 = arith.constant 0 : i32
    %c0_i32_0 = arith.constant 0 : i32
    %c0_i32_1 = arith.constant 0 : i32
    return %arg0, %c0_i32, %c0_i32_0 : i32, i32, i32
  }
  func.func @transform_2(%arg0: i32) -> (i32, i32, i32, i32) {
    %c0_i32 = arith.constant 0 : i32
    %c0_i32_0 = arith.constant 0 : i32
    %c0_i32_1 = arith.constant 0 : i32
    %c0_i32_2 = arith.constant 0 : i32
    return %arg0, %c0_i32, %c0_i32_0, %c0_i32_1 : i32, i32, i32, i32
  }
  func.func @transform_3(%arg0: i32) -> (i32, i32) {
    %c0_i32 = arith.constant 0 : i32
    %c0_i32_0 = arith.constant 0 : i32
    %c0_i32_1 = arith.constant 0 : i32
    return %c0_i32, %c0_i32_0 : i32, i32
  }
  func.func @transform_4(%arg0: i32) -> (i32, i32) {
    %c0_i32 = arith.constant 0 : i32
    %c0_i32_0 = arith.constant 0 : i32
    %c0_i32_1 = arith.constant 0 : i32
    return %c0_i32, %c0_i32_0 : i32, i32
  }
  func.func @transform_5(%arg0: i32) -> (i32, i32) {
    %c0_i32 = arith.constant 0 : i32
    %c0_i32_0 = arith.constant 0 : i32
    %c0_i32_1 = arith.constant 0 : i32
    return %c0_i32, %c0_i32_0 : i32, i32
  }
  func.func @transform_6(%arg0: i32) -> (i32, i32) {
    %c0_i32 = arith.constant 0 : i32
    %c0_i32_0 = arith.constant 0 : i32
    %c0_i32_1 = arith.constant 0 : i32
    return %c0_i32, %c0_i32_0 : i32, i32
  }
  func.func @transform_7(%arg0: i32) -> (i32, i32) {
    %c0_i32 = arith.constant 0 : i32
    %c0_i32_0 = arith.constant 0 : i32
    %c0_i32_1 = arith.constant 0 : i32
    return %c0_i32, %c0_i32_0 : i32, i32
  }
  func.func @transform_8(%arg0: i32) -> (i32, i32) {
    %c0_i32 = arith.constant 0 : i32
    %c0_i32_0 = arith.constant 0 : i32
    %c0_i32_1 = arith.constant 0 : i32
    return %c0_i32, %c0_i32_0 : i32, i32
  }
  func.func @transform_9(%arg0: i32) -> (i32, i32) {
    %c0_i32 = arith.constant 0 : i32
    %c0_i32_0 = arith.constant 0 : i32
    %c0_i32_1 = arith.constant 0 : i32
    return %c0_i32, %c0_i32_0 : i32, i32
  }
  func.func @transform_10(%arg0: i32) -> (i32, i32) {
    %c0_i32 = arith.constant 0 : i32
    %c0_i32_0 = arith.constant 0 : i32
    %c0_i32_1 = arith.constant 0 : i32
    return %c0_i32, %c0_i32_0 : i32, i32
  }
  func.func @transform_11(%arg0: i32) -> (i32, i32, i32) {
    %c0_i32 = arith.constant 0 : i32
    %c0_i32_0 = arith.constant 0 : i32
    %c0_i32_1 = arith.constant 0 : i32
    return %arg0, %c0_i32, %c0_i32_0 : i32, i32, i32
  }
  func.func @transform_12(%arg0: i32) -> (i32, i32, i32) {
    %c0_i32 = arith.constant 0 : i32
    %c0_i32_0 = arith.constant 0 : i32
    %c0_i32_1 = arith.constant 0 : i32
    return %arg0, %c0_i32, %c0_i32_0 : i32, i32, i32
  }
  func.func @transform_13(%arg0: i32) -> (i32, i32, i32) {
    %c0_i32 = arith.constant 0 : i32
    %c0_i32_0 = arith.constant 0 : i32
    %c0_i32_1 = arith.constant 0 : i32
    return %arg0, %c0_i32, %c0_i32_0 : i32, i32, i32
  }
  func.func @transform_14(%arg0: i32) -> (i32, i32, i32) {
    %c0_i32 = arith.constant 0 : i32
    %c0_i32_0 = arith.constant 0 : i32
    %c0_i32_1 = arith.constant 0 : i32
    return %arg0, %c0_i32, %c0_i32_0 : i32, i32, i32
  }
}

</mosaic_0001>

<bundles_post_ra>
// kernel: tpu_custom_call.1
= control target key start
LH: loop header
LB: loop body
LE: loop exit
PB: predicated region body
PF: predicated region fallthrough
CT: control target
= control target key end

     0   :  { %s2931_s0 = inlined_call_operand.hbm [shape: f32[2,16,3], index: 0, kind: input, shape index: {}]   ;;  %s2932_s1 = inlined_call_operand.hbm [shape: f32[2,16,32], index: 1, kind: input, shape index: {}]   ;;  %s2933_s2 = inlined_call_operand.hbm [shape: f32[2,3,16,16], index: 2, kind: input, shape index: {}]   ;;  %s2934_s3 = inlined_call_operand.hbm [shape: f32[1,16], index: 3, kind: input, shape index: {}]   ;;  %s2935_s4 = inlined_call_operand.hbm [shape: bf16[32,32], index: 4, kind: input, shape index: {}]   ;;  %s2936_s5 = inlined_call_operand.hbm [shape: f32[1,32], index: 5, kind: input, shape index: {}]   ;;  %s2937_s6 = inlined_call_operand.hbm [shape: bf16[32,16], index: 6, kind: input, shape index: {}]   ;;  %s2938_s7 = inlined_call_operand.hbm [shape: bf16[32,16], index: 7, kind: input, shape index: {}]   ;;  %s2939_s8 = inlined_call_operand.hbm [shape: f32[1,16], index: 8, kind: input, shape index: {}]   ;;  %s2940_s9 = inlined_call_operand.hbm [shape: bf16[32,15], index: 9, kind: input, shape index: {}]   ;;  %s2941_s10 = inlined_call_operand.hbm [shape: f32[1,15], index: 10, kind: input, shape index: {}]   ;;  %s2942_s11 = inlined_call_operand.hbm [shape: f32[2,16,3], index: 11, kind: output, shape index: {0}]   ;;  %s2943_s12 = inlined_call_operand.hbm [shape: f32[2,16,15], index: 12, kind: output, shape index: {1}]   ;;  %s2944_s13 = inlined_call_operand.hbm [shape: f32[2,16,16], index: 13, kind: output, shape index: {2}]   ;;  %s2945_s14 = inlined_call_operand.hbm [shape: f32[2,16,16], index: 14, kind: output, shape index: {3}]  }
   0x1   :  { %2982 = sst [smem:[#allocation42_spill]] %s2932_s1 }
   0x2   :  { %2983 = sst [smem:[#allocation43_spill]] %s2934_s3 }
   0x3   :  { %2984 = sst [smem:[#allocation44_spill]] %s2936_s5 }
   0x4   :  { %2985 = sst [smem:[#allocation45_spill]] %s2938_s7 }
   0x5   :  { %2986 = sst [smem:[#allocation46_spill]] %s2940_s9 }
   0x6   :  { %2987 = sst [smem:[#allocation47_spill]] %s2942_s11 }
   0x7   :  { %2988 = sst [smem:[#allocation48_spill]] %s2943_s12 }
   0x8   :  { %2989 = sst [smem:[#allocation49_spill]] %s2944_s13 }
   0x9   :  { %2990 = sst [smem:[#allocation50_spill]] %s2945_s14 }
   0xa   :  { %20 = vsyncpa [#allocation3], 0 }
   0xb   :  { %22 = vsyncpa [#allocation3 + $0x1], 0 }
   0xc   :  { %23 = vsyncpa [#allocation6], 0 }
   0xd   :  { %25 = vsyncpa [#allocation6 + $0x1], 0 }
   0xe   :  { %26 = vsyncpa [#allocation9], 0 }
   0xf   :  { %27 = vsyncpa [#allocation12], 0 }
  0x10   :  { %28 = vsyncpa [#allocation15], 0 }
  0x11   :  { %29 = vsyncpa [#allocation18], 0 }
  0x12   :  { %30 = vsyncpa [#allocation4], 0 }
  0x13   :  { %32 = vsyncpa [#allocation4 + $0x1], 0 }
  0x14   :  { %33 = vsyncpa [#allocation22], 0 }
  0x15   :  { %35 = vsyncpa [#allocation22 + $0x1], 0 }
  0x16   :  { %36 = vsyncpa [#allocation25], 0 }
  0x17   :  { %38 = vsyncpa [#allocation25 + $0x1], 0  ;;  %s2290_s29 = smov 0   ;;  %s2292_s30 = smov 0  }
  0x18   :  { %s2294_s15 = smov 0   ;;  %s2296_s16 = smov 0  }
  0x19 LB: > { %2991 = sst [smem:[#allocation35_spill]] %s2178_s29  ;;  %s2192_s17 = smov [#allocation8]   ;;  %s2190_s16 = sphi %s2296_s16, %s3044_s16   ;;  %s2186_s15 = sphi %s2294_s15, %s3046_s15   ;;  %s2182_s30 = sphi %s2292_s30, %s3048_s30   ;;  %s2178_s29 = sphi %s2290_s29, %s3047_s29  }
  0x1a   : > { %2992 = sst [smem:[#allocation36_spill]] %s2186_s15  ;;  %s412_s18 = sshll.u32 %s2192_s17, 4  ;;  %s2316_s18 = int_to_ptr.vmem [resolvable:$true] %s412_s18 }
  0x1b   : > { %s2311_s19 = sadd.s32 4294967295, %s2190_s16   ;;  %p1401_p0 = scmp.ge.s32.totalorder %s2190_s16, 1 }
  0x1c   : > { %2993 = sst [smem:[#allocation37_spill]] %s2311_s19  ;;  %p2950_p1 = scmp.eq.s32.totalorder %s2311_s19, 0 }
  0x1d   : > { %p399_p2 = scmp.lt.s32.totalorder %s2190_s16, 3  ;;  %s2193_s21 = smov [#allocation11]  }
  0x1e   : > { %s436_s22 = sshll.u32 %s2193_s21, 4  ;;  %s2194_s24 = smov [#allocation14]   ;;  %s2325_s22 = int_to_ptr.vmem [resolvable:$true] %s436_s22 }
  0x1f   : > { %p2318_p3 = pnand %p1401_p0, %p399_p2  ;;  %s459_s25 = sshll.u32 %s2194_s24, 4  ;;  %s2333_s25 = int_to_ptr.vmem [resolvable:$true] %s459_s25 }
  0x20   : > { %s2996_s3 = sld [smem:[#allocation43_spill]] }
  0x21   : > { %s2994_s20 = scalar_select %p2318_p3, 1, 0 }
  0x22   : > { %p1568_p5 = pneg %p2318_p3 }
  0x24   : > { %p2329_p6 = pnand %p1568_p5, %p2950_p1 }
  0x26   : > { %s2995_s23 = scalar_select %p2329_p6, 1, 0 }
  0x27   : > { %s1698_s28 = scalar_lea.hbm %s2996_s3, 16  ;;  %p2343_p8 = pneg %p2329_p6 }
  0x28   : > { %p1699_p7 = scmp.ne.s32.totalorder %s2996_s3, %s1698_s28  ;;  %p1705_p11 = scmp.lt.u32.totalorder %s1698_s28, %s2996_s3 }
  0x29   : > { %s2997_s21 = scalar_select %p2343_p8, 1, 0 }
  0x2a   : > { %p1701_p9 = pnand %p2343_p8, %p1699_p7 }
  0x2c   : > { %p1702_p10 = pneg %p1701_p9 }
  0x2e   : > { %p1707_p12 = pnand %p1705_p11, %p1702_p10 }
  0x30   : > { %1710 = shalt.err (!%p1707_p12)
}
  0x31   : > { %s1711_s13 = scalar_lea.vmem %s2316_s18, 16  ;;  %s1718_s26 = scalar_lea.vmem %s2316_s18, 32 }
  0x32   : > { %p1712_p13 = scmp.ne.s32.totalorder %s2316_s18, %s1711_s13  ;;  %p1719_p5 = scmp.lt.s32.totalorder %s2316_s18, %s2316_s18 }
  0x33   : > { %p1720_p7 = scmp.lt.s32.totalorder %s1718_s26, %s1711_s13 }
  0x34   : > { %p1714_p0 = pnand %p1712_p13, %p2343_p8 }
  0x35   : > { %p1721_p9 = por %p1720_p7, %p1719_p5 }
  0x36   : > { %p1715_p2 = pneg %p1714_p0 }
  0x38   : > { %p1722_p4 = pnand %p1721_p9, %p1715_p2 }
  0x3a   : > { %1725 = shalt.err (!%p1722_p4)
}
  0x3b   : > { %1571 = dma.hbm_to_vmem [thread:$0]  (!%p2329_p6), %s2996_s3, 16, %s2316_s18, [#allocation9]  }
  0x3c   : > { %s2998_s5 = sld [smem:[#allocation44_spill]] }
  0x42   : > { %s1726_s24 = scalar_lea.hbm %s2998_s5, 16 }
  0x43   : > { %p1727_p10 = scmp.ne.s32.totalorder %s2998_s5, %s1726_s24  ;;  %p1733_p4 = scmp.lt.u32.totalorder %s1726_s24, %s2998_s5 }
  0x45   : > { %p1729_p11 = pnand %p1727_p10, %p2343_p8 }
  0x47   : > { %p1730_p12 = pneg %p1729_p11 }
  0x49   : > { %p1735_p13 = pnand %p1733_p4, %p1730_p12 }
  0x4b   : > { %1738 = shalt.err (!%p1735_p13)
}
  0x4c   : > { %s1739_s18 = scalar_lea.vmem %s2325_s22, 16  ;;  %s1746_s11 = scalar_lea.vmem %s2325_s22, 32 }
  0x4d   : > { %p1740_p0 = scmp.ne.s32.totalorder %s2325_s22, %s1739_s18  ;;  %p1747_p7 = scmp.lt.s32.totalorder %s2325_s22, %s2325_s22 }
  0x4e   : > { %p1748_p9 = scmp.lt.s32.totalorder %s1746_s11, %s1739_s18 }
  0x4f   : > { %p1742_p2 = pnand %p1740_p0, %p2343_p8 }
  0x50   : > { %p1749_p10 = por %p1748_p9, %p1747_p7 }
  0x51   : > { %p1743_p5 = pneg %p1742_p2 }
  0x53   : > { %p1750_p11 = pnand %p1749_p10, %p1743_p5 }
  0x55   : > { %1753 = shalt.err (!%p1750_p11)
}
  0x56   : > { %1577 = dma.hbm_to_vmem [thread:$0]  (!%p2329_p6), %s2998_s5, 16, %s2325_s22, [#allocation12]  }
  0x57   : > { %s2999_s7 = sld [smem:[#allocation45_spill]] }
  0x5d   : > { %s1754_s17 = scalar_lea.hbm %s2999_s7, 256 }
  0x5e   : > { %p1755_p12 = scmp.ne.s32.totalorder %s2999_s7, %s1754_s17  ;;  %p1761_p0 = scmp.lt.u32.totalorder %s1754_s17, %s2999_s7 }
  0x60   : > { %p1757_p4 = pnand %p1755_p12, %p2343_p8 }
  0x62   : > { %p1758_p13 = pneg %p1757_p4 }
  0x64   : > { %p1763_p2 = pnand %p1761_p0, %p1758_p13 }
  0x66   : > { %1766 = shalt.err (!%p1763_p2)
}
  0x67   : > { %s1767_s22 = scalar_lea.vmem %s2333_s25, 256  ;;  %p1775_p10 = scmp.lt.s32.totalorder %s2333_s25, %s2333_s25 }
  0x68   : > { %p1768_p5 = scmp.ne.s32.totalorder %s2333_s25, %s1767_s22  ;;  %p1776_p11 = scmp.lt.s32.totalorder %s1767_s22, %s1767_s22 }
  0x6a   : > { %p1770_p7 = pnand %p1768_p5, %p2343_p8  ;;  %p1777_p12 = por %p1776_p11, %p1775_p10 }
  0x6c   : > { %p1771_p9 = pneg %p1770_p7 }
  0x6e   : > { %p1778_p4 = pnand %p1777_p12, %p1771_p9 }
  0x70   : > { %1781 = shalt.err (!%p1778_p4)
}
  0x71   : > { %s2953_s11 = smov 64   ;;  %s2955_s14 = smov 4  }
  0x72   : > { %1583 = dma.hbm_to_vmem [thread:$0]  (!%p2329_p6), %s2999_s7, 256, %s2333_s25, [#allocation15], %s2953_s11, %s2953_s11, %s2955_s14  }
  0x73   : > { %s2197_s28 = smov [#allocation17]   ;;  %s3000_s9 = sld [smem:[#allocation46_spill]] }
  0x74   : > { %s483_s17 = sshll.u32 %s2197_s28, 4  ;;  %s484_s17 = int_to_ptr.vmem [resolvable:$true] %s483_s17 }
  0x79   : > { %s1782_s26 = scalar_lea.hbm %s3000_s9, 256 }
  0x7a   : > { %p1783_p13 = scmp.ne.s32.totalorder %s3000_s9, %s1782_s26  ;;  %p1789_p5 = scmp.lt.u32.totalorder %s1782_s26, %s3000_s9 }
  0x7c   : > { %p1785_p0 = pnand %p1783_p13, %p2343_p8 }
  0x7e   : > { %p1786_p2 = pneg %p1785_p0 }
  0x80   : > { %p1791_p7 = pnand %p1789_p5, %p1786_p2 }
  0x82   : > { %1794 = shalt.err (!%p1791_p7)
}
  0x83   : > { %s1795_s25 = scalar_lea.vmem %s484_s17, 256  ;;  %p1803_p12 = scmp.lt.s32.totalorder %s484_s17, %s484_s17 }
  0x84   : > { %p1796_p9 = scmp.ne.s32.totalorder %s484_s17, %s1795_s25  ;;  %p1804_p4 = scmp.lt.s32.totalorder %s1795_s25, %s1795_s25 }
  0x86   : > { %p1798_p10 = pnand %p1796_p9, %p2343_p8  ;;  %p1805_p1 = por %p1804_p4, %p1803_p12 }
  0x88   : > { %p1799_p11 = pneg %p1798_p10 }
  0x8a   : > { %p1806_p3 = pnand %p1805_p1, %p1799_p11 }
  0x8c   : > { %1809 = shalt.err (!%p1806_p3)
}
  0x8d   : > { %1589 = dma.hbm_to_vmem [thread:$0]  (!%p2329_p6), %s3000_s9, 256, %s484_s17, [#allocation18], %s2953_s11, %s2953_s11, %s2955_s14  }
  0x8e   : > { %s2952_s12 = sadd.s32 4294967294, %s2190_s16   ;;  %s2438_s27 = sadd.s32 1, %s2190_s16  }
  0x8f   : > { %3001 = sst [smem:[#allocation38_spill]] %s2438_s27  ;;  %s48_s28 = ssub.s32 %s2190_s16, %s2438_s27 }
  0x90   : > { %s51_s24 = sadd.s32 1, %s2186_s15  ;;  %p49_p1 = scmp.eq.s32.totalorder %s48_s28, 0 }
  0x91   : > { %p58_p3 = scmp.ne.s32.totalorder %s2186_s15, %s2182_s30  ;;  %p59_p13 = scmp.eq.s32.totalorder %s2190_s16, 0 }
  0x92   : > { %p64_p0 = scmp.ne.s32.totalorder %s2182_s30, %s2178_s29  ;;  %p3003_p5 = scmp.eq.s32.totalorder %s2311_s19, 0 }
  0x93   : > { %s2449_s13 = scalar_select %p49_p1, %s2186_s15, %s51_s24  }
  0x94   : > { %p60_p2 = por %p59_p13, %p58_p3  ;;  %p2453_p7 = por %p3003_p5, %p64_p0 }
  0x95   : > { %3002 = sst [smem:[#allocation39_spill]] %s2449_s13  ;;  %p308_p9 = scmp.eq.s32.totalorder %s2311_s19, 1 }
  0x96   : > { %s3004_s26 = scalar_select %p2453_p7, 1, 0 }
  0x97   : > { %p314_p10 = scmp.eq.s32.totalorder %s2952_s12, 1  ;;  %p1624_p11 = scmp.lt.s32.totalorder %s2190_s16, 2 }
  0x98   : > { %s2462_s17 = sand.u32 1, %s2186_s15   ;;  %p2464_p12 = por %p308_p9, %p58_p3 }
  0x99   : > { %p2468_p4 = por %p314_p10, %p64_p0  ;;  %s2960_s25 = sshll.u32 %s2462_s17, 4 }
  0x9a   : > { %s3005_s18 = scalar_select %p2464_p12, 1, 0 }
  0x9b   : > { %s3007_s22 = scalar_select %p2468_p4, 1, 0 }
  0x9c   : > { %3006 = sst [smem:[#allocation40_spill]] %s3005_s18  ;;  %s2961_s3 = sshll.u32 %s2190_s16, 8 }
  0x9d   : > { %3008 = sst [smem:[#allocation41_spill]] %s3007_s22  ;;  %p2474_p1 = pnand %p1624_p11, %p60_p2 }
  0x9e   : > { %s529_s28 = sand.u32 1, %s2190_s16   ;;  %s3010_s1 = sld [smem:[#allocation42_spill]] }
  0x9f   : > { %s3009_s5 = scalar_select %p2474_p1, 1, 0 }
  0xa0   : > { %s533_s14 = scalar_lea.vmem [#allocation5], %s2960_s25  ;;  %s2198_s9 = smov [#allocation10]  }
  0xa1   : > { %s540_s7 = sshll.u32 %s533_s14, 4  ;;  %s2490_s13 = sshll.u32 %s2198_s9, 4  ;;  %s2488_s7 = int_to_ptr.vmem [resolvable:$true] %s540_s7  ;;  %s423_s13 = int_to_ptr.vmem [resolvable:$true] %s2490_s13 }
  0xa2   : > { %s2492_s15 = scalar_lea.sflag [#allocation6], %s529_s28  ;;  %p2498_p13 = pneg %p2474_p1 }
  0xa4   : > { %s2484_s11 = scalar_lea.hbm %s3010_s1, %s2961_s3  ;;  %s1815_s25 = scalar_lea.hbm %s3010_s1, 512 }
  0xa5   : > { %s1810_s27 = scalar_lea.hbm %s2484_s11, 256  ;;  %p1816_p5 = scmp.lt.u32.totalorder %s2484_s11, %s3010_s1 }
  0xa6   : > { %p1811_p3 = scmp.ne.s32.totalorder %s2484_s11, %s1810_s27  ;;  %p1817_p9 = scmp.lt.u32.totalorder %s1815_s25, %s1810_s27 }
  0xa7   : > { %s3011_s12 = scalar_select %p2498_p13, 1, 0 }
  0xa8   : > { %p1813_p0 = pnand %p2498_p13, %p1811_p3  ;;  %p1818_p10 = por %p1817_p9, %p1816_p5 }
  0xa9   : > { %p1819_p11 = scmp.lt.u32.totalorder %s1810_s27, %s2484_s11 }
  0xaa   : > { %p1814_p2 = pneg %p1813_p0 }
  0xab   : > { %p1820_p4 = por %p1819_p11, %p1818_p10 }
  0xad   : > { %p1821_p12 = pnand %p1820_p4, %p1814_p2 }
  0xaf   : > { %1824 = shalt.err (!%p1821_p12)
}
  0xb0   : > { %s1825_s28 = scalar_lea.vmem %s2488_s7, 256  ;;  %s2199_s24 = smov [#allocation5]  }
  0xb1   : > { %p1826_p3 = scmp.ne.s32.totalorder %s2488_s7, %s1825_s28  ;;  %s1830_s14 = sshll.u32 %s2199_s24, 4  ;;  %s1831_s14 = int_to_ptr.vmem [resolvable:$false] %s1830_s14 }
  0xb2   : > { %s1832_s3 = scalar_lea.vmem %s1831_s14, 512  ;;  %p1833_p6 = scmp.lt.s32.totalorder %s2488_s7, %s1831_s14 }
  0xb3   : > { %p1828_p0 = pnand %p1826_p3, %p2498_p13  ;;  %p1834_p8 = scmp.lt.s32.totalorder %s1832_s3, %s1825_s28 }
  0xb5   : > { %p1829_p7 = pneg %p1828_p0  ;;  %p1835_p5 = por %p1834_p8, %p1833_p6 }
  0xb7   : > { %p1836_p9 = pnand %p1835_p5, %p1829_p7 }
  0xb9   : > { %1839 = shalt.err (!%p1836_p9)
}
  0xba   : > { %s2972_s27 = smov 128   ;;  %s2974_s25 = smov 8  }
  0xbb   : > { %1599 = dma.hbm_to_vmem [thread:$0]  (!%p2474_p1), %s2484_s11, 256, %s2488_s7, %s2492_s15, %s2972_s27, %s2972_s27, %s2974_s25  }
  0xbc   : > { %s1840_s28 = scalar_lea.hbm %s2935_s4, 256  ;;  %p3012_p8 = scmp.ne.s32.totalorder %s2997_s21, 0 }
  0xbd   : > { %p1841_p6 = scmp.ne.s32.totalorder %s2935_s4, %s1840_s28  ;;  %p1847_p4 = scmp.lt.u32.totalorder %s1840_s28, %s2935_s4 }
  0xbf   : > { %p1843_p7 = pnand %p1841_p6, %p3012_p8 }
  0xc1   : > { %p1844_p12 = pneg %p1843_p7 }
  0xc3   : > { %p1849_p2 = pnand %p1847_p4, %p1844_p12 }
  0xc5   : > { %1852 = shalt.err (!%p1849_p2)
}
  0xc6   : > { %s1853_s29 = scalar_lea.vmem %s423_s13, 256  ;;  %p1861_p0 = scmp.lt.s32.totalorder %s423_s13, %s423_s13 }
  0xc7   : > { %p1854_p10 = scmp.ne.s32.totalorder %s423_s13, %s1853_s29  ;;  %p1862_p5 = scmp.lt.s32.totalorder %s1853_s29, %s1853_s29 }
  0xc9   : > { %p1856_p11 = pnand %p1854_p10, %p3012_p8  ;;  %p1863_p9 = por %p1862_p5, %p1861_p0 }
  0xcb   : > { %p1857_p3 = pneg %p1856_p11 }
  0xcd   : > { %p1864_p1 = pnand %p1863_p9, %p1857_p3 }
  0xcf   : > { %1867 = shalt.err (!%p1864_p1)
}
  0xd0   : > { %p3013_p6 = scmp.ne.s32.totalorder %s2995_s23, 0  ;;  %s3014_s7 = smov 4  }
  0xd1   : > { %s3015_s11 = smov 64   ;;  %s2202_s9 = smov [#allocation13]  }
  0xd2   : > { %1574 = dma.hbm_to_vmem [thread:$0]  (!%p3013_p6), %s2935_s4, 256, %s423_s13, [#allocation9], %s3015_s11, %s3015_s11, %s3014_s7  }
  0xd3   : > { %s446_s24 = sshll.u32 %s2202_s9, 4  ;;  %s2203_s28 = smov [#allocation16]   ;;  %s447_s24 = int_to_ptr.vmem [resolvable:$true] %s446_s24 }
  0xd4   : > { %s473_s14 = sshll.u32 %s2203_s28, 4  ;;  %s1868_s27 = scalar_lea.hbm %s2937_s6, 256  ;;  %s474_s14 = int_to_ptr.vmem [resolvable:$true] %s473_s14 }
  0xd5   : > { %p1869_p1 = scmp.ne.s32.totalorder %s2937_s6, %s1868_s27  ;;  %p1875_p4 = scmp.lt.u32.totalorder %s1868_s27, %s2937_s6 }
  0xd7   : > { %p1871_p7 = pnand %p1869_p1, %p3012_p8 }
  0xd9   : > { %p1872_p12 = pneg %p1871_p7 }
  0xdb   : > { %p1877_p2 = pnand %p1875_p4, %p1872_p12 }
  0xdd   : > { %1880 = shalt.err (!%p1877_p2)
}
  0xde   : > { %s1881_s13 = scalar_lea.vmem %s447_s24, 256  ;;  %p1889_p0 = scmp.lt.s32.totalorder %s447_s24, %s447_s24 }
  0xdf   : > { %p1882_p10 = scmp.ne.s32.totalorder %s447_s24, %s1881_s13  ;;  %p1890_p5 = scmp.lt.s32.totalorder %s1881_s13, %s1881_s13 }
  0xe1   : > { %p1884_p11 = pnand %p1882_p10, %p3012_p8  ;;  %p1891_p9 = por %p1890_p5, %p1889_p0 }
  0xe3   : > { %p1885_p3 = pneg %p1884_p11 }
  0xe5   : > { %p1892_p13 = pnand %p1891_p9, %p1885_p3 }
  0xe7   : > { %1895 = shalt.err (!%p1892_p13)
}
  0xe8   : > { %1580 = dma.hbm_to_vmem [thread:$0]  (!%p3013_p6), %s2937_s6, 256, %s447_s24, [#allocation12], %s3015_s11, %s3015_s11, %s3014_s7  }
  0xe9   : > { %s1896_s22 = scalar_lea.hbm %s2939_s8, 16 }
  0xea   : > { %p1897_p1 = scmp.ne.s32.totalorder %s2939_s8, %s1896_s22  ;;  %p1903_p12 = scmp.lt.u32.totalorder %s1896_s22, %s2939_s8 }
  0xec   : > { %p1899_p13 = pnand %p1897_p1, %p3012_p8 }
  0xee   : > { %p1900_p7 = pneg %p1899_p13 }
  0xf0   : > { %p1905_p4 = pnand %p1903_p12, %p1900_p7 }
  0xf2   : > { %1908 = shalt.err (!%p1905_p4)
}
  0xf3   : > { %s1909_s1 = scalar_lea.vmem %s474_s14, 16  ;;  %s1916_s7 = scalar_lea.vmem %s474_s14, 32 }
  0xf4   : > { %p1910_p2 = scmp.ne.s32.totalorder %s474_s14, %s1909_s1  ;;  %p1917_p3 = scmp.lt.s32.totalorder %s474_s14, %s474_s14 }
  0xf5   : > { %p1918_p0 = scmp.lt.s32.totalorder %s1916_s7, %s1909_s1 }
  0xf6   : > { %p1912_p10 = pnand %p1910_p2, %p3012_p8 }
  0xf7   : > { %p1919_p5 = por %p1918_p0, %p1917_p3 }
  0xf8   : > { %p1913_p11 = pneg %p1912_p10 }
  0xfa   : > { %p1920_p9 = pnand %p1919_p5, %p1913_p11 }
  0xfc   : > { %1923 = shalt.err (!%p1920_p9)
}
  0xfd   : > { %1586 = dma.hbm_to_vmem [thread:$0]  (!%p3013_p6), %s2939_s8, 16, %s474_s14, [#allocation15]  }
  0xfe   : > { %s2204_s13 = smov [#allocation19]   ;;  %s1924_s25 = scalar_lea.hbm %s2941_s10, 16 }
  0xff   : > { %s497_s19 = sshll.u32 %s2204_s13, 4  ;;  %p1925_p1 = scmp.ne.s32.totalorder %s2941_s10, %s1924_s25  ;;  %s498_s19 = int_to_ptr.vmem [resolvable:$true] %s497_s19 }
 0x100   : > { %p1931_p12 = scmp.lt.u32.totalorder %s1924_s25, %s2941_s10 }
 0x101   : > { %p1927_p13 = pnand %p1925_p1, %p3012_p8 }
 0x103   : > { %p1928_p7 = pneg %p1927_p13 }
 0x105   : > { %p1933_p4 = pnand %p1931_p12, %p1928_p7 }
 0x107   : > { %1936 = shalt.err (!%p1933_p4)
}
 0x108   : > { %s1937_s14 = scalar_lea.vmem %s498_s19, 16  ;;  %s1944_s29 = scalar_lea.vmem %s498_s19, 32 }
 0x109   : > { %p1938_p2 = scmp.ne.s32.totalorder %s498_s19, %s1937_s14  ;;  %p1945_p3 = scmp.lt.s32.totalorder %s498_s19, %s498_s19 }
 0x10a   : > { %p1946_p0 = scmp.lt.s32.totalorder %s1944_s29, %s1937_s14 }
 0x10b   : > { %p1940_p10 = pnand %p1938_p2, %p3012_p8 }
 0x10c   : > { %p1947_p5 = por %p1946_p0, %p1945_p3 }
 0x10d   : > { %p1941_p11 = pneg %p1940_p10 }
 0x10f   : > { %p1948_p9 = pnand %p1947_p5, %p1941_p11 }
 0x111   : > { %1951 = shalt.err (!%p1948_p9)
}
 0x112   : > { %1592 = dma.hbm_to_vmem [thread:$0]  (!%p3013_p6), %s2941_s10, 16, %s498_s19, [#allocation18]  }
 0x113   : > { %s3016_s21 = sshll.u32 %s2190_s16, 8  ;;  %s3017_s18 = sshll.u32 %s2462_s17, 4 }
 0x114   : > { %s2609_s13 = scalar_lea.hbm %s2931_s0, %s3016_s21  ;;  %s512_s23 = scalar_lea.vmem [#allocation2], %s3017_s18 }
 0x115   : > { %s519_s27 = sshll.u32 %s512_s23, 4  ;;  %s1519_s25 = smul.u32 48, %s2462_s17  ;;  %s2613_s27 = int_to_ptr.vmem [resolvable:$true] %s519_s27 }
 0x116   : > { %s509_s22 = scalar_lea.sflag [#allocation3], %s2462_s17  ;;  %s1952_s9 = scalar_lea.hbm %s2609_s13, 256 }
 0x117   : > { %p1953_p8 = scmp.ne.s32.totalorder %s2609_s13, %s1952_s9  ;;  %p3018_p6 = scmp.ne.s32.totalorder %s3011_s12, 0 }
 0x118   : > { %s1957_s3 = scalar_lea.hbm %s2931_s0, 512  ;;  %p1958_p7 = scmp.lt.u32.totalorder %s2609_s13, %s2931_s0 }
 0x119   : > { %p1955_p1 = pnand %p1953_p8, %p3018_p6  ;;  %p1959_p12 = scmp.lt.u32.totalorder %s1957_s3, %s1952_s9 }
 0x11a   : > { %p1961_p2 = scmp.lt.u32.totalorder %s1952_s9, %s2609_s13 }
 0x11b   : > { %p1956_p13 = pneg %p1955_p1  ;;  %p1960_p4 = por %p1959_p12, %p1958_p7 }
 0x11d   : > { %p1962_p10 = por %p1961_p2, %p1960_p4 }
 0x11f   : > { %p1963_p11 = pnand %p1962_p10, %p1956_p13 }
 0x121   : > { %1966 = shalt.err (!%p1963_p11)
}
 0x122   : > { %s1967_s1 = scalar_lea.vmem %s2613_s27, 256  ;;  %s2205_s7 = smov [#allocation2]  }
 0x123   : > { %p1968_p3 = scmp.ne.s32.totalorder %s2613_s27, %s1967_s1  ;;  %s1972_s21 = sshll.u32 %s2205_s7, 4  ;;  %s1973_s21 = int_to_ptr.vmem [resolvable:$false] %s1972_s21 }
 0x124   : > { %s1974_s11 = scalar_lea.vmem %s1973_s21, 512  ;;  %p1975_p9 = scmp.lt.s32.totalorder %s2613_s27, %s1973_s21 }
 0x125   : > { %p1970_p0 = pnand %p1968_p3, %p3018_p6  ;;  %p1976_p8 = scmp.lt.s32.totalorder %s1974_s11, %s1967_s1 }
 0x127   : > { %p1971_p5 = pneg %p1970_p0  ;;  %p1977_p1 = por %p1976_p8, %p1975_p9 }
 0x129   : > { %p1978_p7 = pnand %p1977_p1, %p1971_p5 }
 0x12b   : > { %1981 = shalt.err (!%p1978_p7)
}
 0x12c   : > { %p3019_p13 = scmp.ne.s32.totalorder %s3009_s5, 0  ;;  %s3020_s24 = smov 8  }
 0x12d   : > { %s3021_s18 = smov 128   ;;  %s1520_s23 = smul.u32 768, %s2190_s16 }
 0x12e   : > { %1596 = dma.hbm_to_vmem [thread:$0]  (!%p3019_p13), %s2609_s13, 256, %s2613_s27, %s509_s22, %s3021_s18, %s3021_s18, %s3020_s24  }
 0x12f   : > { %s554_s9 = scalar_lea.vmem [#allocation7], %s1519_s25  ;;  %s2649_s14 = scalar_lea.hbm %s2933_s2, %s1520_s23 }
 0x130   : > { %s561_s19 = sshll.u32 %s554_s9, 4  ;;  %s1982_s29 = scalar_lea.hbm %s2649_s14, 768  ;;  %s2651_s19 = int_to_ptr.vmem [resolvable:$true] %s561_s19 }
 0x131   : > { %p1983_p12 = scmp.ne.s32.totalorder %s2649_s14, %s1982_s29  ;;  %s1987_s27 = scalar_lea.hbm %s2933_s2, 1536 }
 0x132   : > { %p1988_p10 = scmp.lt.u32.totalorder %s2649_s14, %s2933_s2  ;;  %p1989_p11 = scmp.lt.u32.totalorder %s1987_s27, %s1982_s29 }
 0x133   : > { %p1985_p4 = pnand %p1983_p12, %p3018_p6  ;;  %p1991_p0 = scmp.lt.u32.totalorder %s1982_s29, %s2649_s14 }
 0x134   : > { %p1990_p3 = por %p1989_p11, %p1988_p10 }
 0x135   : > { %p1986_p2 = pneg %p1985_p4 }
 0x136   : > { %p1992_p5 = por %p1991_p0, %p1990_p3 }
 0x138   : > { %p1993_p9 = pnand %p1992_p5, %p1986_p2 }
 0x13a   : > { %1996 = shalt.err (!%p1993_p9)
}
 0x13b   : > { %s1997_s1 = scalar_lea.vmem %s2651_s19, 768  ;;  %s2206_s7 = smov [#allocation7]  }
 0x13c   : > { %p1998_p8 = scmp.ne.s32.totalorder %s2651_s19, %s1997_s1  ;;  %s2002_s21 = sshll.u32 %s2206_s7, 4  ;;  %s2003_s21 = int_to_ptr.vmem [resolvable:$false] %s2002_s21 }
 0x13d   : > { %s2004_s11 = scalar_lea.vmem %s2003_s21, 1536  ;;  %p2005_p12 = scmp.lt.s32.totalorder %s2651_s19, %s2003_s21 }
 0x13e   : > { %p2000_p1 = pnand %p1998_p8, %p3018_p6  ;;  %p2006_p4 = scmp.lt.s32.totalorder %s2004_s11, %s1997_s1 }
 0x140   : > { %p2001_p7 = pneg %p2000_p1  ;;  %p2007_p10 = por %p2006_p4, %p2005_p12 }
 0x142   : > { %p2008_p11 = pnand %p2007_p10, %p2001_p7 }
 0x144   : > { %2011 = shalt.err (!%p2008_p11)
}
 0x145   : > { %1602 = dma.hbm_to_vmem [thread:$0]  (!%p3019_p13), %s2649_s14, 768, %s2651_s19, %s2492_s15, %s3021_s18, %s3021_s18, %s3020_s24  }
 0x146   : > { %p3022_p6 = scmp.ne.s32.totalorder %s2994_s20, 0 }
 0x147   : > { %s2681_s12 = sand.u32 (!%p3022_p6), 1, %s2182_s30   ;;  %p3023_p2 = scmp.ne.s32.totalorder (!%p3022_p6), %s3004_s26, 0 }
 0x148   : > { %573 = sbr.rel (%p3022_p6) target bundleno = 893 (0x37d), region = 64  ;;  %s2684_s23 = sshll.u32 (!%p3022_p6), %s2681_s12, 4 }
 0x149   : > { %s576_s5 = scalar_lea.sflag (!%p3022_p6), [#allocation3], %s2681_s12  ;;  %s579_s9 = scalar_lea.vmem (!%p3022_p6), [#allocation2], %s2684_s23 }
 0x14f   : > { %2141 = dma.done.wait (%p3023_p2), %s576_s5, 256  }
 0x150   : > { %2143 = vsyncadd (%p3023_p2), %s576_s5, 4294967040  ;;  %s3024_s15 = sld [smem:[#allocation37_spill]]  ;;  %s588_s18 = scalar_lea.vmem [#allocation5], %s2684_s23 }
 0x156   : > { %s584_s20 = sand.u32 1, %s3024_s15  }
 0x157   : > { %s585_s24 = scalar_lea.sflag [#allocation6], %s584_s20 }
 0x158   : > { %2145 = dma.done.wait (%p3023_p2), %s585_s24, 1024  }
 0x159   : > { %2147 = vsyncadd (%p3023_p2), %s585_s24, 4294966272  ;;  %s1521_s19 = smul.u32 48, %s2681_s12  ;;  %p3025_p13 = scmp.eq.s32.totalorder %s3024_s15, 0 }
 0x15b   : > { %s2701_s28 = scalar_lea.vmem [#allocation7], %s1521_s19 }
 0x15c   : > { %2149 = dma.done.wait (%p3025_p13), [#allocation9], 272   ;;  %p3026_p3 = pmov %p3025_p13 }
 0x15e   : > { %2151 = vsyncadd (%p3026_p3), [#allocation9], 4294967024  ;;  %p3027_p0 = pmov %p3026_p3 }
 0x160   : > { %2153 = dma.done.wait (%p3027_p0), [#allocation12], 272   ;;  %p3028_p5 = pmov %p3027_p0 }
 0x161   : > { %p3029_p9 = pmov %p3027_p0 }
 0x162   : > { %2155 = vsyncadd (%p3028_p5), [#allocation12], 4294967024 }
 0x163   : > { %2157 = dma.done.wait (%p3029_p9), [#allocation15], 272   ;;  %p3030_p8 = pmov %p3027_p0 }
 0x164   : > { %p3031_p1 = pmov %p3027_p0 }
 0x165   : > { %2159 = vsyncadd (%p3030_p8), [#allocation15], 4294967024 }
 0x166   : > { %2161 = dma.done.wait (%p3031_p1), [#allocation18], 272   ;;  %p3032_p7 = pmov %p3027_p0 }
 0x167   : > { %v2207_v0 = vmov 0.0   ;;  %vm2208_vm0 = vmmov 0   ;;  %v1682_v1 = vld [vmem:[#allocation10] sm:$0xff]   ;;  %v1683_v2 = vld [vmem:[#allocation10 + $0x8] sm:$0xff]   ;;  %vm726_vm1 = vcmask 261120   ;;  %v1684_v6 = vld [vmem:[#allocation13] sm:$0xff]  }
 0x168   : > { %2163 = vsyncadd (%p3032_p7), [#allocation18], 4294967024  ;;  %1487 = vmatprep.subr.bf16.mxu0 %v2207_v0  ;;  %1491 = vmatprep.mubr.msk.bf16.mxu0 %vm2208_vm0, %v2207_v0  ;;  %v700_v3 = vld [vmem:[%s588_s18] sm:$0xff]  ;;  %v701_v4 = vld [vmem:[%s588_s18 + $0x8] sm:$0xff]  ;;  %vm846_vm2 = vcmask 130048   ;;  %vm1029_vm3 = vcmask 7168  }
 0x169   : > { %1495 = vmatprep.subr.bf16.mxu1 %v2207_v0  ;;  %1499 = vmatprep.mubr.msk.bf16.mxu1 %vm2208_vm0, %v2207_v0  ;;  %v702_v5 = vpack.c.bf16 %v701_v4, %v700_v3  ;;  %v1685_v7 = vld [vmem:[#allocation14] sm:$0xff]   ;;  %v1686_v8 = vld [vmem:[#allocation13 + $0x8] sm:$0xff]   ;;  %v1687_v9 = vld [vmem:[#allocation14 + $0x8] sm:$0xff]   ;;  %vm1032_vm4 = vcmask 15360   ;;  %vm1035_vm5 = vcmask 23552   ;;  %s3033_s26 = sld [smem:[#allocation40_spill]] }
 0x16a   : > { %1488 = vmatpush3.bf16.msra.mxu0 %v1682_v1  ;;  %1496 = vmatpush3.bf16.msra.mxu1 %v1684_v6  ;;  %v982_v10 = vld [vmem:[%s2701_s28] sm:$0xff]  ;;  %v1451_v12 = vld [vmem:[%s2701_s28 + $0x10] sm:$0xff]  ;;  %v983_v15 = vld [vmem:[%s2701_s28 + $0x8] sm:$0xff]  ;;  %s677_s3 = scalar_lea.vmem [#allocation20], %s2684_s23  ;;  %s2757_s14 = sshll.u32 %s3024_s15, 8 }
 0x16b   : > { %1489 = vmatprep.subr.bf16.mxu0 %v2207_v0  ;;  %1497 = vmatprep.subr.bf16.mxu1 %v2207_v0  ;;  %v1450_v11 = vld [vmem:[#allocation8] ss:$0 sm:$0xff]  ;;  %v1452_v16 = vld [vmem:[%s2701_s28 + $0x18] sm:$0xff]  ;;  %v1454_v20 = vld [vmem:[%s2701_s28 + $0x28] sm:$0xff]  ;;  %s1067_s29 = sshll.u32 %s677_s3, 4  ;;  %s3034_s27 = sld [smem:[#allocation47_spill]]  ;;  %s2765_s29 = int_to_ptr.vmem [resolvable:$true] %s1067_s29 }
 0x16c   : > { %v991_v13 = vmul.f32 %v1450_v11, %v982_v10  ;;  %v1006_v14 = vmul.f32 %v1451_v12, %v1450_v11  ;;  %v992_v17 = vmul.f32 %v1450_v11, %v983_v15  ;;  %v1007_v18 = vmul.f32 %v1452_v16, %v1450_v11  ;;  %v1453_v19 = vld [vmem:[%s2701_s28 + $0x20] sm:$0xff]  ;;  %v1000_v55 = vld [vmem:[%s579_s9 + $0x8] sm:$0xff]  ;;  %s1039_s22 = scalar_lea.sflag [#allocation4], %s2681_s12  ;;  %s2012_s1 = scalar_lea.vmem %s2765_s29, 256 }
 0x16d   : > { %v1019_v25 = vmul.f32 %v1453_v19, %v1450_v11  ;;  %v1020_v26 = vmul.f32 %v1454_v20, %v1450_v11  ;;  %v1433_v29 = vld [vmem:[#allocation11] ss:$0 sm:$0xff]  ;;  %v1688_v46 = vld [vmem:[#allocation17] sm:$0xff]   ;;  %v1689_v48 = vld [vmem:[#allocation17 + $0x8] sm:$0xff]   ;;  %p2013_p12 = scmp.ne.s32.totalorder %s2765_s29, %s2012_s1  ;;  %s2209_s7 = smov [#allocation20]  }
 0x16e   : > { %1490 = vmatpush3.bf16.msra.mxu0 %v1683_v2  ;;  %1498 = vmatpush3.bf16.msra.mxu1 %v1686_v8  ;;  %v993_v21 = vsel %vm846_vm2, %v991_v13, 0.0  ;;  %v1008_v22 = vsel %vm846_vm2, %v1006_v14, 0.0  ;;  %v996_v23 = vsel %vm846_vm2, %v992_v17, 0.0  ;;  %v1011_v24 = vsel %vm846_vm2, %v1007_v18, 0.0  ;;  %v999_v50 = vld [vmem:[%s579_s9] sm:$0xff]  ;;  %s2016_s21 = sshll.u32 %s2209_s7, 4  ;;  %s2017_s21 = int_to_ptr.vmem [resolvable:$false] %s2016_s21 }
 0x16f   : > { %1503 = vmatprep.subr.bf16.mxu0 %v2207_v0  ;;  %1511 = vmatprep.subr.bf16.mxu1 %v2207_v0  ;;  %v1021_v27 = vsel %vm846_vm2, %v1019_v25, 0.0  ;;  %v1024_v28 = vsel %vm846_vm2, %v1020_v26, 0.0  ;;  %p3035_p4 = scmp.ne.s32.totalorder %s3033_s26, 0  ;;  %s2018_s11 = scalar_lea.vmem %s2017_s21, 512 }
 0x170   : > { %994 = vadd.xlane.f32.xlu0 %v993_v21  ;;  %1009 = vadd.xlane.f32.xlu1 %v1008_v22  ;;  %p2019_p6 = scmp.lt.s32.totalorder %s2765_s29, %s2017_s21  ;;  %p2020_p2 = scmp.lt.s32.totalorder %s2018_s11, %s2012_s1 }
 0x171   : > { %1492 = vmatmul.mubr.msk.bf16.vlgmr.msra.gmra.mrb[0].mxu0 %vm726_vm1, %v702_v5  ;;  %s2763_s25 = scalar_lea.hbm %s3034_s27, %s2757_s14  ;;  %p2014_p10 = pnand %p2013_p12, %p3035_p4 }
 0x172   : > { %1507 = vmatprep.mubr.msk.bf16.mxu0 %vm2208_vm0, %v2207_v0  ;;  %1504 = vmatpush3.bf16.msra.mxu0 %v1685_v7  ;;  %p2021_p13 = por %p2020_p2, %p2019_p6 }
 0x173   : > { %1505 = vmatprep.subr.bf16.mxu0 %v2207_v0  ;;  %p2015_p11 = pneg %p2014_p10 }
 0x174   : > { %997 = vadd.xlane.f32.xlu0 %v996_v23  ;;  %1012 = vadd.xlane.f32.xlu1 %v1011_v24 }
 0x175   : > { %p2022_p3 = pnand %p2021_p13, %p2015_p11 }
 0x176   : > { %1506 = vmatpush3.bf16.msra.mxu0 %v1687_v9 }
 0x178   : > { %1022 = vadd.xlane.f32.xlu0 %v1021_v27  ;;  %1025 = vadd.xlane.f32.xlu1 %v1024_v28 }
 0x1fd   : > { %v995_v49 = vpop.xlane.xlu0 %994  ;;  %v1010_v51 = vpop.xlane.xlu1 %1009 }
 0x1fe   : > { %v1001_v53 = vadd.f32 %v999_v50, %v995_v49  ;;  %v1014_v54 = vadd.f32 %v1010_v51, %v999_v50 }
 0x200   : > { %v1030_v56 = vsel %vm1029_vm3, %v1001_v53, %v1014_v54 }
 0x201   : > { %v998_v52 = vpop.xlane.xlu0 %997  ;;  %v1013_v58 = vpop.xlane.xlu1 %1012 }
 0x202   : > { %v1002_v57 = vadd.f32 %v1000_v55, %v998_v52  ;;  %v1015_v61 = vadd.f32 %v1013_v58, %v1000_v55 }
 0x204   : > { %v1031_v63 = vsel %vm1029_vm3, %v1002_v57, %v1015_v61 }
 0x205   : > { %v1023_v59 = vpop.xlane.xlu0 %1022 }
 0x206   : > { %v1027_v60 = vadd.f32 %v1023_v59, %v999_v50 }
 0x208   : > { %v1033_v62 = vsel %vm1032_vm4, %v1030_v56, %v1027_v60 }
 0x209   : > { %1036 = vst.msk [vmem:[%s677_s3] sm:$0xff] %vm1035_vm5, %v1033_v62 }
 0x244   : > { %v764_v30 = vpop.f32.mrb[0].mxu0 }
 0x245   : > { %v765_v31 = vadd.f32 %v1433_v29, %v764_v30  ;;  %v1493_v32 = vpop.f32.mrb[1].mxu0 }
 0x246   : > { %v767_v33 = vpop.f32.mrb[2].mxu0 }
 0x247   : > { %v1437_v34 = vmul.f32 -1.442695, %v765_v31  ;;  %v768_v35 = vadd.f32 %v1433_v29, %v767_v33  ;;  %v1494_v36 = vpop.f32.mrb[3].mxu0 }
 0x249   : > { %1690 = vpow2.f32 %v1437_v34  ;;  %v1438_v37 = vmul.f32 -1.442695, %v768_v35 }
 0x24b   : > { %1692 = vpow2.f32 %v1438_v37 }
 0x253   : > { %v1691_v38 = vpop.eup %1690 }
 0x254   : > { %v777_v39 = vadd.f32 1.0, %v1691_v38 }
 0x255   : > { %v1693_v40 = vpop.eup %1692 }
 0x256   : > { %1694 = vrcp.f32 %v777_v39  ;;  %v778_v41 = vadd.f32 1.0, %v1693_v40 }
 0x258   : > { %1696 = vrcp.f32 %v778_v41 }
 0x260   : > { %v1695_v42 = vpop.eup %1694 }
 0x261   : > { %v783_v44 = vmul.f32 %v1695_v42, %v765_v31 }
 0x262   : > { %v1697_v43 = vpop.eup %1696 }
 0x263   : > { %v784_v45 = vmul.f32 %v1697_v43, %v768_v35 }
 0x265   : > { %v785_v47 = vpack.c.bf16 %v784_v45, %v783_v44 }
 0x267   : > { %1500 = vmatmul.mubr.msk.bf16.vlgmr.msra.gmra.mrb[0].mxu1 %vm726_vm1, %v785_v47  ;;  %1508 = vmatmul.mubr.msk.bf16.vlgmr.msra.gmra.mrb[4].mxu0 %vm726_vm1, %v785_v47 }
 0x268   : > { %1512 = vmatpush3.bf16.msra.mxu1 %v1688_v46  ;;  %1515 = vmatprep.mubr.msk.bf16.mxu1 %vm2208_vm0, %v2207_v0 }
 0x269   : > { %1513 = vmatprep.subr.bf16.mxu1 %v2207_v0  ;;  %v1026_v0 = vpop.xlane.xlu1 %1025 }
 0x26a   : > { %v1028_v1 = vadd.f32 %v1026_v0, %v1000_v55 }
 0x26c   : > { %1514 = vmatpush3.bf16.msra.mxu1 %v1689_v48  ;;  %v1034_v2 = vsel %vm1032_vm4, %v1031_v63, %v1028_v1 }
 0x26d   : > { %1037 = vst.msk [vmem:[%s677_s3 + $0x8] sm:$0xff] %vm1035_vm5, %v1034_v2 }
 0x26f   : > { %1516 = vmatmul.mubr.msk.bf16.vlgmr.msra.gmra.mrb[4].mxu1 %vm726_vm1, %v785_v47 }
 0x270   : > { %2025 = shalt.err (!%p2022_p3)
}
 0x271   : > { %s2026_s5 = scalar_lea.hbm %s2763_s25, 256  ;;  %s2030_s18 = scalar_lea.hbm %s3034_s27, 512 }
 0x272   : > { %p2027_p0 = scmp.ne.s32.totalorder %s2763_s25, %s2026_s5  ;;  %p2031_p8 = scmp.lt.u32.totalorder %s2763_s25, %s3034_s27 }
 0x273   : > { %p2032_p1 = scmp.lt.u32.totalorder %s2030_s18, %s2026_s5  ;;  %p2034_p12 = scmp.lt.u32.totalorder %s2026_s5, %s2763_s25 }
 0x274   : > { %p2028_p5 = pnand %p2027_p0, %p3035_p4 }
 0x275   : > { %p2033_p7 = por %p2032_p1, %p2031_p8 }
 0x276   : > { %p2029_p9 = pneg %p2028_p5 }
 0x277   : > { %p2035_p10 = por %p2034_p12, %p2033_p7 }
 0x279   : > { %p2036_p11 = pnand %p2035_p10, %p2029_p9 }
 0x27b   : > { %2039 = shalt.err (!%p2036_p11)
}
 0x27c   : > { %s2210_s3 = smov 128   ;;  %s2211_s13 = smov 8   ;;  %v1442_v3 = vld [vmem:[#allocation16] ss:$0 sm:$0xff]  ;;  %v1446_v14 = vld [vmem:[#allocation19] ss:$0 sm:$0xff] }
 0x27d   : > { %1560 = dma.vmem_to_hbm [thread:$0]  (%p3035_p4), %s2765_s29, 256, %s2763_s25, %s1039_s22, %s2210_s3, %s2210_s3, %s2211_s13  }
 0x27e   : > { %s698_s17 = scalar_lea.vmem [#allocation24], %s2684_s23  ;;  %s2796_s7 = scalar_lea.vmem [#allocation23], %s2684_s23 }
 0x27f   : > { %s1115_s1 = sshll.u32 %s698_s17, 4  ;;  %s3036_s22 = sld [smem:[#allocation50_spill]]  ;;  %s2800_s1 = int_to_ptr.vmem [resolvable:$true] %s1115_s1 }
 0x280   : > { %s1054_s11 = scalar_lea.sflag [#allocation25], %s2681_s12  ;;  %s2040_s5 = scalar_lea.vmem %s2800_s1, 256 }
 0x281   : > { %p2041_p6 = scmp.ne.s32.totalorder %s2800_s1, %s2040_s5  ;;  %s2212_s9 = smov [#allocation24]  }
 0x282   : > { %s2044_s24 = sshll.u32 %s2212_s9, 4  ;;  %s2045_s24 = int_to_ptr.vmem [resolvable:$false] %s2044_s24 }
 0x283   : > { %p2042_p2 = pnand %p2041_p6, %p3035_p4  ;;  %s2046_s18 = scalar_lea.vmem %s2045_s24, 512 }
 0x284   : > { %p2047_p3 = scmp.lt.s32.totalorder %s2800_s1, %s2045_s24  ;;  %p2048_p0 = scmp.lt.s32.totalorder %s2046_s18, %s2040_s5 }
 0x285   : > { %s2809_s21 = scalar_lea.hbm %s3036_s22, %s2757_s14  ;;  %p2043_p13 = pneg %p2042_p2 }
 0x286   : > { %p2049_p5 = por %p2048_p0, %p2047_p3 }
 0x288   : > { %p2050_p9 = pnand %p2049_p5, %p2043_p13 }
 0x33a   : > { %v839_v4 = vpop.f32.mrb[0].mxu1  ;;  %v906_v5 = vpop.f32.mrb[4].mxu0 }
 0x33b   : > { %847 = vst.msk [vmem:[%s2796_s7] sm:$0xff] %vm846_vm2, %v839_v4  ;;  %v907_v6 = vadd.f32 %v1442_v3, %v906_v5  ;;  %v1501_v7 = vpop.f32.mrb[1].mxu1  ;;  %v1509_v8 = vpop.f32.mrb[5].mxu0 }
 0x33c   : > { %v842_v9 = vpop.f32.mrb[2].mxu1  ;;  %v909_v10 = vpop.f32.mrb[6].mxu0 }
 0x33d   : > { %913 = vst.msk [vmem:[%s698_s17] sm:$0xff] %vm846_vm2, %v907_v6  ;;  %848 = vst.msk [vmem:[%s2796_s7 + $0x8] sm:$0xff] %vm846_vm2, %v842_v9  ;;  %v910_v11 = vadd.f32 %v1442_v3, %v909_v10  ;;  %v1502_v12 = vpop.f32.mrb[3].mxu1  ;;  %v1510_v13 = vpop.f32.mrb[7].mxu0 }
 0x33f   : > { %914 = vst.msk [vmem:[%s698_s17 + $0x8] sm:$0xff] %vm846_vm2, %v910_v11 }
 0x340   : > { %2053 = shalt.err (!%p2050_p9)
}
 0x341   : > { %s2054_s19 = scalar_lea.hbm %s2809_s21, 256  ;;  %s2058_s29 = scalar_lea.hbm %s3036_s22, 512 }
 0x342   : > { %p2055_p8 = scmp.ne.s32.totalorder %s2809_s21, %s2054_s19  ;;  %p2059_p12 = scmp.lt.u32.totalorder %s2809_s21, %s3036_s22 }
 0x343   : > { %p2060_p10 = scmp.lt.u32.totalorder %s2058_s29, %s2054_s19  ;;  %p2062_p6 = scmp.lt.u32.totalorder %s2054_s19, %s2809_s21 }
 0x344   : > { %p2056_p1 = pnand %p2055_p8, %p3035_p4 }
 0x345   : > { %p2061_p11 = por %p2060_p10, %p2059_p12 }
 0x346   : > { %p2057_p7 = pneg %p2056_p1 }
 0x347   : > { %p2063_p2 = por %p2062_p6, %p2061_p11 }
 0x349   : > { %p2064_p13 = pnand %p2063_p2, %p2057_p7 }
 0x34b   : > { %2067 = shalt.err (!%p2064_p13)
}
 0x34c   : > { %1563 = dma.vmem_to_hbm [thread:$0]  (%p3035_p4), %s2800_s1, 256, %s2809_s21, %s1054_s11, %s2210_s3, %s2210_s3, %s2211_s13   ;;  %v972_v15 = vpop.f32.mrb[4].mxu1  ;;  %vm979_vm6 = vcmask 121856  }
 0x34d   : > { %s684_s5 = scalar_lea.vmem [#allocation21], %s2684_s23  ;;  %s1099_s18 = sshll.u32 %s2796_s7, 4  ;;  %v973_v16 = vadd.f32 %v1446_v14, %v972_v15  ;;  %v1517_v17 = vpop.f32.mrb[5].mxu1  ;;  %s2849_s18 = int_to_ptr.vmem [resolvable:$true] %s1099_s18 }
 0x34e   : > { %s1083_s24 = sshll.u32 %s684_s5, 4  ;;  %v975_v18 = vpop.f32.mrb[6].mxu1  ;;  %s3037_s23 = sld [smem:[#allocation48_spill]]  ;;  %s2841_s24 = int_to_ptr.vmem [resolvable:$true] %s1083_s24 }
 0x34f   : > { %980 = vst.msk [vmem:[%s684_s5] sm:$0xff] %vm979_vm6, %v973_v16  ;;  %v976_v19 = vadd.f32 %v1446_v14, %v975_v18  ;;  %v1518_v20 = vpop.f32.mrb[7].mxu1  ;;  %s3038_s19 = sld [smem:[#allocation49_spill]]  ;;  %s2859_s17 = scalar_lea.sflag [#allocation22], %s584_s20 }
 0x350   : > { %s2068_s29 = scalar_lea.vmem %s2841_s24, 256  ;;  %s2213_s25 = smov [#allocation21]  }
 0x351   : > { %981 = vst.msk [vmem:[%s684_s5 + $0x8] sm:$0xff] %vm979_vm6, %v976_v19  ;;  %p2069_p3 = scmp.ne.s32.totalorder %s2841_s24, %s2068_s29  ;;  %s2072_s9 = sshll.u32 %s2213_s25, 4  ;;  %s2073_s9 = int_to_ptr.vmem [resolvable:$false] %s2072_s9 }
 0x352   : > { %s2074_s12 = scalar_lea.vmem %s2073_s9, 512  ;;  %p2075_p9 = scmp.lt.s32.totalorder %s2841_s24, %s2073_s9 }
 0x353   : > { %p2070_p0 = pnand %p2069_p3, %p3035_p4  ;;  %p2076_p8 = scmp.lt.s32.totalorder %s2074_s12, %s2068_s29 }
 0x354   : > { %s2847_s21 = scalar_lea.hbm %s3037_s23, %s2757_s14 }
 0x355   : > { %s2855_s28 = scalar_lea.hbm %s3038_s19, %s2757_s14  ;;  %p2071_p5 = pneg %p2070_p0 }
 0x356   : > { %p2077_p1 = por %p2076_p8, %p2075_p9 }
 0x358   : > { %p2078_p7 = pnand %p2077_p1, %p2071_p5 }
 0x35a   : > { %2081 = shalt.err (!%p2078_p7)
}
 0x35b   : > { %s2082_s15 = scalar_lea.hbm %s2847_s21, 256  ;;  %s2086_s5 = scalar_lea.hbm %s3037_s23, 512 }
 0x35c   : > { %p2083_p12 = scmp.ne.s32.totalorder %s2847_s21, %s2082_s15  ;;  %p2087_p6 = scmp.lt.u32.totalorder %s2847_s21, %s3037_s23 }
 0x35d   : > { %p2088_p2 = scmp.lt.u32.totalorder %s2086_s5, %s2082_s15  ;;  %p2090_p3 = scmp.lt.u32.totalorder %s2082_s15, %s2847_s21 }
 0x35e   : > { %p2084_p10 = pnand %p2083_p12, %p3035_p4 }
 0x35f   : > { %p2089_p13 = por %p2088_p2, %p2087_p6 }
 0x360   : > { %p2085_p11 = pneg %p2084_p10 }
 0x361   : > { %p2091_p0 = por %p2090_p3, %p2089_p13 }
 0x363   : > { %p2092_p5 = pnand %p2091_p0, %p2085_p11 }
 0x365   : > { %2095 = shalt.err (!%p2092_p5)
}
 0x366   : > { %1561 = dma.vmem_to_hbm [thread:$0]  (%p3035_p4), %s2841_s24, 256, %s2847_s21, %s2859_s17, %s2210_s3, %s2210_s3, %s2211_s13  }
 0x367   : > { %s2096_s7 = scalar_lea.vmem %s2849_s18, 256  ;;  %s2214_s29 = smov [#allocation23]  }
 0x368   : > { %p2097_p9 = scmp.ne.s32.totalorder %s2849_s18, %s2096_s7  ;;  %s2100_s25 = sshll.u32 %s2214_s29, 4  ;;  %s2101_s25 = int_to_ptr.vmem [resolvable:$false] %s2100_s25 }
 0x369   : > { %s2102_s9 = scalar_lea.vmem %s2101_s25, 512  ;;  %p2103_p7 = scmp.lt.s32.totalorder %s2849_s18, %s2101_s25 }
 0x36a   : > { %p2098_p8 = pnand %p2097_p9, %p3035_p4  ;;  %p2104_p12 = scmp.lt.s32.totalorder %s2102_s9, %s2096_s7 }
 0x36c   : > { %p2099_p1 = pneg %p2098_p8  ;;  %p2105_p10 = por %p2104_p12, %p2103_p7 }
 0x36e   : > { %p2106_p11 = pnand %p2105_p10, %p2099_p1 }
 0x370   : > { %2109 = shalt.err (!%p2106_p11)
}
 0x371   : > { %s2110_s24 = scalar_lea.hbm %s2855_s28, 256  ;;  %s2114_s15 = scalar_lea.hbm %s3038_s19, 512 }
 0x372   : > { %p2111_p6 = scmp.ne.s32.totalorder %s2855_s28, %s2110_s24  ;;  %p2115_p3 = scmp.lt.u32.totalorder %s2855_s28, %s3038_s19 }
 0x373   : > { %p2116_p0 = scmp.lt.u32.totalorder %s2114_s15, %s2110_s24  ;;  %p2118_p9 = scmp.lt.u32.totalorder %s2110_s24, %s2855_s28 }
 0x374   : > { %p2112_p2 = pnand %p2111_p6, %p3035_p4 }
 0x375   : > { %p2117_p5 = por %p2116_p0, %p2115_p3 }
 0x376   : > { %p2113_p13 = pneg %p2112_p2 }
 0x377   : > { %p2119_p8 = por %p2118_p9, %p2117_p5 }
 0x379   : > { %p2120_p1 = pnand %p2119_p8, %p2113_p13 }
 0x37b   : > { %2123 = shalt.err (!%p2120_p1)
}
 0x37c   : > { %1562 = dma.vmem_to_hbm [thread:$0]  (%p3035_p4), %s2849_s18, 256, %s2855_s28, %s2859_s17, %s2210_s3, %s2210_s3, %s2211_s13  }
 0x37d PF: > { %s3039_s5 = sld [smem:[#allocation35_spill]]  ;;  %s3040_s1 = sld [smem:[#allocation41_spill]] }
 0x37e   : > { %p3042_p12 = scmp.ge.s32.totalorder %s2190_s16, 2 }
 0x383   : > { %s1130_s11 = sand.u32 1, %s3039_s5   ;;  %p3041_p7 = scmp.ne.s32.totalorder %s3040_s1, 0 }
 0x384   : > { %s1131_s7 = scalar_lea.sflag [#allocation4], %s1130_s11 }
 0x385   : > { %p1604_p10 = pnand %p3042_p12, %p3041_p7 }
 0x387   : > { %2165 = dma.done.wait (!%p1604_p10), %s1131_s7, 256  }
 0x388   : > { %2167 = vsyncadd (!%p1604_p10), %s1131_s7, 4294967040  ;;  %s3043_s26 = sadd.s32 4294967294, %s2190_s16  }
 0x389   : > { %s1139_s29 = sand.u32 1, %s3043_s26  }
 0x38a   : > { %s1140_s25 = scalar_lea.sflag [#allocation22], %s1139_s29 }
 0x38b   : > { %2169 = dma.done.wait (!%p1604_p10), %s1140_s25, 512  }
 0x38c   : > { %2171 = vsyncadd (!%p1604_p10), %s1140_s25, 4294966784  ;;  %s1158_s9 = scalar_lea.sflag [#allocation25], %s1130_s11 }
 0x38d   : > { %2173 = dma.done.wait (!%p1604_p10), %s1158_s9, 256  }
 0x38e   : > { %2175 = vsyncadd (!%p1604_p10), %s1158_s9, 4294967040  ;;  %s3044_s16 = sld [smem:[#allocation38_spill]]  ;;  %s3045_s3 = sld [smem:[#allocation36_spill]] }
 0x38f   : > { %s3046_s15 = sld [smem:[#allocation39_spill]]  ;;  %s3047_s29 = smov %s2182_s30 }
 0x394   : > { %p41_p4 = scmp.ge.s32.totalorder %s3044_s16, 4   ;;  %s3048_s30 = smov %s3045_s3 }
 0x396   :  { %43 = sbr.rel (!%p41_p4) target bundleno = 25 (0x19), region = 216 }
 0x39d   :  { %1163 = vsyncpa [#allocation3], 1 }
 0x39e   :  { %1165 = vsyncpa [#allocation3 + $0x1], 1 }
 0x39f   :  { %1166 = vsyncpa [#allocation6], 1 }
 0x3a0   :  { %1168 = vsyncpa [#allocation6 + $0x1], 1 }
 0x3a1   :  { %1169 = vsyncpa [#allocation9], 1 }
 0x3a2   :  { %1170 = vsyncpa [#allocation12], 1 }
 0x3a3   :  { %1171 = vsyncpa [#allocation15], 1 }
 0x3a4   :  { %1172 = vsyncpa [#allocation18], 1 }
 0x3a5   :  { %1173 = vsyncpa [#allocation4], 1 }
 0x3a6   :  { %1175 = vsyncpa [#allocation4 + $0x1], 1 }
 0x3a7   :  { %1176 = vsyncpa [#allocation22], 1 }
 0x3a8   :  { %1178 = vsyncpa [#allocation22 + $0x1], 1 }
 0x3a9   :  { %1179 = vsyncpa [#allocation25], 1 }
 0x3aa   :  { %1181 = vsyncpa [#allocation25 + $0x1], 1 }

</bundles_post_ra>
